<compile_context>
chip_gen: v7x
topology: tpu7x:2x2x1
jax: 0.10.0
libtpu: 0.0.40
codegen_flags: <defaults>
</compile_context>

<pallas_src>
import jax
import jax.numpy as jnp
from jax import lax
from jax.experimental import pallas as pl
from jax.experimental.pallas import tpu as pltpu


# ----------------------------------------------------------------------------- #
# Host-side helpers (tiny).
# ----------------------------------------------------------------------------- #
def _interp_matrix_1d(n_in, n_out):
    """(n_out, n_in) bilinear interpolation matrix, align_corners=True."""
    if n_in == 1:
        return jnp.ones((n_out, 1), jnp.float32)
    s = jnp.arange(n_out, dtype=jnp.float32) * (n_in - 1) / (n_out - 1)
    i0 = jnp.clip(jnp.floor(s).astype(jnp.int32), 0, n_in - 1)
    i1 = jnp.clip(i0 + 1, 0, n_in - 1)
    f = (s - i0.astype(jnp.float32))[:, None]
    oh0 = jax.nn.one_hot(i0, n_in, dtype=jnp.float32)
    oh1 = jax.nn.one_hot(i1, n_in, dtype=jnp.float32)
    return oh0 * (1.0 - f) + oh1 * f


def _vmem_sizes():
    """(tile budget, vmem_limit_bytes) derived from this chip's VMEM capacity."""
    cap = 64 * 1024 * 1024                       # v7x-safe default (64 MiB / core)
    try:
        get_info = getattr(pltpu, "get_tpu_info", None)
        if get_info is not None:
            info = get_info()
            for name in ("vmem_capacity_bytes", "vmem_bytes", "vmem_size_bytes"):
                v = getattr(info, name, None)
                if v:
                    cap = int(v)
                    break
    except Exception:
        pass
    limit = min((cap * 3) // 4, 100 * 1024 * 1024)   # 48 MiB on v7x, 96 MiB on v5e/v6e
    budget = min(cap // 4, 32 * 1024 * 1024)         # 16 MiB on v7x, 32 MiB on v5e/v6e
    return budget, limit


def _choose_tile_h(h_up, w_up, cin, cout, h_in, w_in, vmem_budget_bytes):
    """Largest conv-output row tile that keeps the output block valid/lane-dense
    ((th*Wu) % 128 == 0, or th == Hu) AND fits the VMEM budget.  The fallback
    never ignores the budget unless no valid tile fits (then the smallest valid
    tile is returned as a best effort)."""
    def est_bytes(th):
        thp = th + 2
        blocks = 2 * (h_in * cin * w_in          # src            (double buffered)
                      + thp * h_in               # mh tile
                      + w_in * 3 * w_up          # merged horizontal matrix
                      + 9 * cout * cin           # conv weights
                      + cout                     # bias
                      + cout * th * w_up)        # output tile
        interm = (2 * thp * cin * w_in           # v + channel-major copy
                  + 2 * thp * cin * 3 * w_up     # horizontal matmul out + im2col copy
                  + cout * thp * w_up            # per-row-tap matmul result
                  + cout * th * w_up)            # accumulator
        return 4 * (blocks + interm) * 3 // 2    # 1.5x slack for Mosaic temporaries

    divisors = [d for d in range(1, h_up + 1) if h_up % d == 0]
    valid = [d for d in divisors if (d * w_up) % 128 == 0 or d == h_up]
    fitting = [d for d in valid if est_bytes(d) <= vmem_budget_bytes]
    if fitting:
        return max(fitting)
    return min(valid)


# ----------------------------------------------------------------------------- #
# Fused kernel: bilinear x2 upsample + pad + 3x3 conv + bias + PReLU.
# ----------------------------------------------------------------------------- #
def _upsample_conv_prelu_kernel(src_ref, mh_ref, nw_ref, wk_ref, b_ref, a_ref,
                                o_ref):
    # src_ref: (1, H, Cin*W)     low-res rows, columns ordered (c, w)
    # mh_ref : (1, TH+2, H)      per-tile vertical interp (conv row-pad folded in)
    # nw_ref : (W, 3*Wu)         merged horizontal interp, cols ordered (kx, ux)
    #                            (zero col-padding + all three kx taps folded in)
    # wk_ref : (3, Cout, 3*Cin)  per-ky conv weights, columns ordered (ci, kx)
    # b_ref  : (Cout, 1)         conv bias
    # a_ref  : (1, 1)            PReLU alpha (SMEM scalar)
    # o_ref  : (1, Cout, TH*Wu)  NCHW output tile (rows flattened with the W axis)
    h = src_ref.shape[1]
    cin_w = src_ref.shape[2]
    th_p2 = mh_ref.shape[1]
    th = th_p2 - 2
    w_in = nw_ref.shape[0]
    w_up = nw_ref.shape[1] // 3
    cin = cin_w // w_in
    n_out = th * w_up

    # (1) Vertical x2 upsample (+ zero row padding): one MXU matmul.
    #     (TH+2, H) @ (H, Cin*W) -> (TH+2, Cin*W).
    v = jnp.dot(mh_ref[0], src_ref[0], preferred_element_type=jnp.float32)

    # (2) Single hoisted channel-major relayout of W-wide data (previously done
    #     three times on 2W-wide data after the horizontal matmuls).
    v3 = jnp.transpose(v.reshape(th_p2, cin, w_in), (1, 0, 2))
    v3 = v3.reshape(cin * th_p2, w_in)

    # (3) Horizontal x2 upsample (+ zero col padding + all 3 kx taps) as ONE
    #     merged MXU matmul: (Cin*(TH+2), W) @ (W, 3*Wu).
    a = jnp.dot(v3, nw_ref[...], preferred_element_type=jnp.float32)

    # (4) ONE im2col relayout: rows (ci, kx), columns (row, ux).  No per-ky
    #     patches are materialised.
    col = jnp.transpose(a.reshape(cin, th_p2, 3, w_up), (0, 2, 1, 3))
    col = col.reshape(cin * 3, th_p2 * w_up)

    # (5) 3x3 conv: three full-width K=3*Cin matmuls on the untouched im2col
    #     buffer; each row tap contributes through a static shifted window of the
    #     small (Cout, TH*Wu) result.  Accumulator starts as bias + first tap.
    f0 = jnp.dot(wk_ref[0], col, preferred_element_type=jnp.float32)
    acc = b_ref[...] + f0[:, :n_out]
    f1 = jnp.dot(wk_ref[1], col, preferred_element_type=jnp.float32)
    acc = acc + f1[:, w_up:w_up + n_out]
    f2 = jnp.dot(wk_ref[2], col, preferred_element_type=jnp.float32)
    acc = acc + f2[:, 2 * w_up:2 * w_up + n_out]

    # (6) PReLU epilogue, lane-dense (Cout, TH*Wu) store straight into NCHW.
    alpha = a_ref[0, 0]
    o_ref[0] = jnp.where(acc > 0, acc, alpha * acc).astype(o_ref.dtype)


# ----------------------------------------------------------------------------- #
# Wrapper.
# ----------------------------------------------------------------------------- #
@jax.jit
def psp_upsample(x_nchw, w_oihw, bias, alpha):
    """PSPUpsample forward.  x_nchw: (N, Cin, H, W) f32 -> (N, Cout, 2H, 2W) f32."""
    n, cin, h, w = x_nchw.shape
    cout = w_oihw.shape[0]
    h_up, w_up = 2 * h, 2 * w

    vmem_budget, vmem_limit = _vmem_sizes()
    th = _choose_tile_h(h_up, w_up, cin, cout, h, w, vmem_budget)
    num_tiles = h_up // th

    # Low-res source with rows (h) and columns (c, w); the only wrapper transpose
    # is on the small pre-upsample tensor (the 4x tensor never hits HBM).
    src = jnp.transpose(x_nchw, (0, 2, 1, 3)).reshape(n, h, cin * w)

    # Vertical interp matrix with the conv's zero row padding folded in,
    # pre-sliced per tile: mh_tiles[t] covers padded upsampled rows
    # [t*TH, t*TH + TH + 2).
    mh = _interp_matrix_1d(h, h_up)                                    # (Hu, H)
    mh_pad = jnp.zeros((h_up + 2, h), jnp.float32).at[1:h_up + 1].set(mh)
    mh_tiles = jnp.stack(
        [mh_pad[t * th: t * th + th + 2] for t in range(num_tiles)])   # (T, TH+2, H)

    # Merged horizontal interp matrix: zero col padding + all three kx taps folded
    # into a single (W, 3*Wu) operand (one MXU weight pass instead of three):
    # nw_cat[x, kx*Wu + ux] = MwPad[ux + kx, x].
    mw = _interp_matrix_1d(w, w_up)                                    # (Wu, W)
    mw_pad = jnp.zeros((w_up + 2, w), jnp.float32).at[1:w_up + 1].set(mw)
    nw_cat = jnp.stack([mw_pad[kx: kx + w_up] for kx in range(3)])     # (3, Wu, W)
    nw_cat = jnp.transpose(nw_cat, (2, 0, 1)).reshape(w, 3 * w_up)     # (W, 3*Wu)

    # Conv weights per row tap ky, columns ordered (ci, kx) to match the im2col
    # layout; bias as a (Cout, 1) column; PReLU alpha as an SMEM scalar.
    wk = jnp.transpose(w_oihw, (2, 0, 1, 3)).reshape(3, cout, 3 * cin)
    b2 = bias.reshape(cout, 1).astype(jnp.float32)
    a2 = jnp.reshape(alpha, (1, 1)).astype(jnp.float32)

    thp = th + 2
    steps = n * num_tiles
    flops = steps * 2 * (thp * h * cin * w                 # vertical upsample
                         + thp * cin * w * 3 * w_up        # merged horizontal
                         + 3 * cout * 3 * cin * thp * w_up)  # conv row taps
    bytes_accessed = 4 * (n * cin * h * w + n * cout * h_up * w_up
                          + 9 * cin * cout + cout
                          + num_tiles * thp * h + 3 * w * w_up)

    out_flat = pl.pallas_call(
        _upsample_conv_prelu_kernel,
        out_shape=jax.ShapeDtypeStruct((n, cout, h_up * w_up), x_nchw.dtype),
        grid=(n, num_tiles),
        in_specs=[
            # Source block: constant along the tile axis -> resident in VMEM.
            pl.BlockSpec((1, h, cin * w), lambda i, t: (i, 0, 0)),
            # Per-tile vertical interpolation matrix.
            pl.BlockSpec((1, th + 2, h), lambda i, t: (t, 0, 0)),
            # Merged horizontal matrix / conv weights / bias: resident whole call.
            pl.BlockSpec((w, 3 * w_up), lambda i, t: (0, 0)),
            pl.BlockSpec((3, cout, 3 * cin), lambda i, t: (0, 0, 0)),
            pl.BlockSpec((cout, 1), lambda i, t: (0, 0)),
            pl.BlockSpec((1, 1), lambda i, t: (0, 0), memory_space=pltpu.SMEM),
        ],
        out_specs=pl.BlockSpec((1, cout, th * w_up), lambda i, t: (i, 0, t)),
        compiler_params=pltpu.CompilerParams(
            dimension_semantics=("parallel", "parallel"),
            vmem_limit_bytes=int(vmem_limit),
        ),
        cost_estimate=pl.CostEstimate(
            flops=int(flops), transcendentals=0,
            bytes_accessed=int(bytes_accessed)),
    )(src, mh_tiles, nw_cat, wk, b2, a2)

    # Already NCHW: only a metadata reshape, no HBM transpose pass over the output.
    return out_flat.reshape(n, cout, h_up, w_up)


# ----------------------------------------------------------------------------- #
# Pure-JAX reference (independent path) for correctness checking.
# ----------------------------------------------------------------------------- #
def _bilinear_upsample_x2_align_corners(x):
    """x: (N, H, W, C) -> (N, 2H, 2W, C), nn.Upsample(2, 'bilinear', align_corners=True)."""
    n, h, w, c = x.shape
    ho, wo = 2 * h, 2 * w

    def coords(n_in, n_out):
        s = jnp.arange(n_out, dtype=jnp.float32) * (n_in - 1) / (n_out - 1)
        i0 = jnp.clip(jnp.floor(s).astype(jnp.int32), 0, n_in - 1)
        i1 = jnp.clip(i0 + 1, 0, n_in - 1)
        return s - i0.astype(jnp.float32), i0, i1

    fy, y0, y1 = coords(h, ho)
    fx, x0, x1 = coords(w, wo)
    row0, row1 = x[:, y0], x[:, y1]
    fx_b = fx[None, None, :, None]
    top = row0[:, :, x0] * (1.0 - fx_b) + row0[:, :, x1] * fx_b
    bot = row1[:, :, x0] * (1.0 - fx_b) + row1[:, :, x1] * fx_b
    fy_b = fy[None, :, None, None]
    return top * (1.0 - fy_b) + bot * fy_b


def reference_psp_upsample(x_nchw, w_oihw, bias, alpha):
    x = jnp.transpose(x_nchw, (0, 2, 3, 1))
    xu = _bilinear_upsample_x2_align_corners(x)
    w_hwio = jnp.transpose(w_oihw, (2, 3, 1, 0))
    y = lax.conv_general_dilated(
        xu, w_hwio, window_strides=(1, 1), padding="SAME",
        dimension_numbers=("NHWC", "HWIO", "NHWC"))
    y = y + bias[None, None, None, :]
    y = jnp.where(y > 0, y, alpha * y)
    return jnp.transpose(y, (0, 3, 1, 2))


if __name__ == "__main__":
    key = jax.random.PRNGKey(0)
    k_x, k_w, k_b = jax.random.split(key, 3)

    N, Cin, H, W = 2, 4, 16, 16
    Cout = 8

    x = jax.random.normal(k_x, (N, Cin, H, W), dtype=jnp.float32)
    # Conv2d(Cin, Cout, 3, padding=1) parameters.
    w = jax.random.normal(k_w, (Cout, Cin, 3, 3), dtype=jnp.float32) * 0.1
    b = jax.random.normal(k_b, (Cout,), dtype=jnp.float32) * 0.1
    # PReLU default: single shared parameter initialized to 0.25.
    alpha = jnp.float32(0.25)

    out = jax.block_until_ready(psp_upsample(x, w, b, alpha))
    ref = jax.block_until_ready(reference_psp_upsample(x, w, b, alpha))

    assert out.shape == (N, Cout, 2 * H, 2 * W), out.shape
    max_err = float(jnp.max(jnp.abs(out - ref)))
    assert jnp.allclose(out, ref, atol=2e-4, rtol=2e-4), max_err

    print("KERNEL_OK")
</pallas_src>

<mosaic_0001>
module attributes {stable_mosaic.version = 11 : i64} {
  func.func @_upsample_conv_prelu_kernel(%arg0: i32, %arg1: i32, %arg2: memref<1x16x64xf32, #tpu.memory_space<vmem>>, %arg3: memref<1x34x16xf32, #tpu.memory_space<vmem>>, %arg4: memref<16x96xf32, #tpu.memory_space<vmem>>, %arg5: memref<3x8x12xf32, #tpu.memory_space<vmem>>, %arg6: memref<8x1xf32, #tpu.memory_space<vmem>>, %arg7: memref<1x1xf32, #tpu.memory_space<smem>>, %arg8: memref<1x8x1024xf32, #tpu.memory_space<vmem>>) attributes {dimension_semantics = [#tpu.dimension_semantics<parallel>, #tpu.dimension_semantics<parallel>], iteration_bounds = array<i64: 2, 1>, scalar_prefetch = 0 : i64, scratch_operands = 0 : i64, tpu.core_type = #tpu.core_type<tc>, window_params = [{transform_indices = @transform_0, window_bounds = array<i64: 1, 16, 64>}, {transform_indices = @transform_1, window_bounds = array<i64: 1, 34, 16>}, {pipeline_mode = #tpu.pipeline_mode<synchronous>, transform_indices = @transform_2, window_bounds = array<i64: 16, 96>}, {pipeline_mode = #tpu.pipeline_mode<synchronous>, transform_indices = @transform_3, window_bounds = array<i64: 3, 8, 12>}, {pipeline_mode = #tpu.pipeline_mode<synchronous>, transform_indices = @transform_4, window_bounds = array<i64: 8, 1>}, {transform_indices = @transform_5, window_bounds = array<i64: 1, 1>}, {transform_indices = @transform_6, window_bounds = array<i64: 1, 8, 1024>}]} {
    %c0 = arith.constant 0 : index
    %c0_0 = arith.constant 0 : index
    %c0_1 = arith.constant 0 : index
    %0 = vector.load %arg3[%c0, %c0_0, %c0_1] : memref<1x34x16xf32, #tpu.memory_space<vmem>>, vector<1x34x16xf32>
    %1 = vector.shape_cast %0 : vector<1x34x16xf32> to vector<34x16xf32>
    %c0_2 = arith.constant 0 : index
    %c0_3 = arith.constant 0 : index
    %c0_4 = arith.constant 0 : index
    %2 = vector.load %arg2[%c0_2, %c0_3, %c0_4] : memref<1x16x64xf32, #tpu.memory_space<vmem>>, vector<1x16x64xf32>
    %3 = vector.shape_cast %2 : vector<1x16x64xf32> to vector<16x64xf32>
    %cst = arith.constant dense<0.000000e+00> : vector<34x64xf32>
    %4 = tpu.matmul %1, %3, %cst {dimension_numbers = #tpu.dot_dimension_numbers<[1], [0], [0], [1], [0, 0, 1, 1], [], []>} : vector<34x16xf32>, vector<16x64xf32>, vector<34x64xf32> -> vector<34x64xf32>
    %5 = vector.shape_cast %4 : vector<34x64xf32> to vector<34x4x16xf32>
    %6 = tpu.transpose %5, [1, 0, 2] : vector<34x4x16xf32> -> vector<4x34x16xf32>
    %7 = vector.shape_cast %6 : vector<4x34x16xf32> to vector<136x16xf32>
    %c0_5 = arith.constant 0 : index
    %c0_6 = arith.constant 0 : index
    %8 = vector.load %arg4[%c0_5, %c0_6] : memref<16x96xf32, #tpu.memory_space<vmem>>, vector<16x96xf32>
    %cst_7 = arith.constant dense<0.000000e+00> : vector<136x96xf32>
    %9 = tpu.matmul %7, %8, %cst_7 {dimension_numbers = #tpu.dot_dimension_numbers<[1], [0], [0], [1], [0, 0, 1, 1], [], []>} : vector<136x16xf32>, vector<16x96xf32>, vector<136x96xf32> -> vector<136x96xf32>
    %10 = vector.shape_cast %9 : vector<136x96xf32> to vector<4x34x3x32xf32>
    %11 = tpu.transpose %10, [0, 2, 1, 3] : vector<4x34x3x32xf32> -> vector<4x3x34x32xf32>
    %12 = vector.shape_cast %11 : vector<4x3x34x32xf32> to vector<12x1088xf32>
    %c0_8 = arith.constant 0 : index
    %c0_9 = arith.constant 0 : index
    %c0_10 = arith.constant 0 : index
    %13 = vector.load %arg5[%c0_8, %c0_9, %c0_10] : memref<3x8x12xf32, #tpu.memory_space<vmem>>, vector<1x8x12xf32>
    %14 = vector.shape_cast %13 : vector<1x8x12xf32> to vector<8x12xf32>
    %cst_11 = arith.constant dense<0.000000e+00> : vector<8x1088xf32>
    %15 = tpu.matmul %14, %12, %cst_11 {dimension_numbers = #tpu.dot_dimension_numbers<[1], [0], [0], [1], [0, 0, 1, 1], [], []>} : vector<8x12xf32>, vector<12x1088xf32>, vector<8x1088xf32> -> vector<8x1088xf32>
    %c0_12 = arith.constant 0 : index
    %c0_13 = arith.constant 0 : index
    %16 = vector.load %arg6[%c0_12, %c0_13] : memref<8x1xf32, #tpu.memory_space<vmem>>, vector<8x1xf32>
    %17 = vector.extract_strided_slice %15 {offsets = [0, 0], sizes = [8, 1024], strides = [1, 1]} : vector<8x1088xf32> to vector<8x1024xf32>
    %18 = vector.broadcast %16 : vector<8x1xf32> to vector<8x1024xf32>
    %19 = arith.addf %18, %17 : vector<8x1024xf32>
    %c1 = arith.constant 1 : index
    %c0_14 = arith.constant 0 : index
    %c0_15 = arith.constant 0 : index
    %20 = vector.load %arg5[%c1, %c0_14, %c0_15] : memref<3x8x12xf32, #tpu.memory_space<vmem>>, vector<1x8x12xf32>
    %21 = vector.shape_cast %20 : vector<1x8x12xf32> to vector<8x12xf32>
    %cst_16 = arith.constant dense<0.000000e+00> : vector<8x1088xf32>
    %22 = tpu.matmul %21, %12, %cst_16 {dimension_numbers = #tpu.dot_dimension_numbers<[1], [0], [0], [1], [0, 0, 1, 1], [], []>} : vector<8x12xf32>, vector<12x1088xf32>, vector<8x1088xf32> -> vector<8x1088xf32>
    %23 = vector.extract_strided_slice %22 {offsets = [0, 32], sizes = [8, 1024], strides = [1, 1]} : vector<8x1088xf32> to vector<8x1024xf32>
    %24 = arith.addf %19, %23 : vector<8x1024xf32>
    %c2 = arith.constant 2 : index
    %c0_17 = arith.constant 0 : index
    %c0_18 = arith.constant 0 : index
    %25 = vector.load %arg5[%c2, %c0_17, %c0_18] : memref<3x8x12xf32, #tpu.memory_space<vmem>>, vector<1x8x12xf32>
    %26 = vector.shape_cast %25 : vector<1x8x12xf32> to vector<8x12xf32>
    %cst_19 = arith.constant dense<0.000000e+00> : vector<8x1088xf32>
    %27 = tpu.matmul %26, %12, %cst_19 {dimension_numbers = #tpu.dot_dimension_numbers<[1], [0], [0], [1], [0, 0, 1, 1], [], []>} : vector<8x12xf32>, vector<12x1088xf32>, vector<8x1088xf32> -> vector<8x1088xf32>
    %28 = vector.extract_strided_slice %27 {offsets = [0, 64], sizes = [8, 1024], strides = [1, 1]} : vector<8x1088xf32> to vector<8x1024xf32>
    %29 = arith.addf %24, %28 : vector<8x1024xf32>
    %c0_20 = arith.constant 0 : index
    %c0_21 = arith.constant 0 : index
    %30 = memref.load %arg7[%c0_20, %c0_21] : memref<1x1xf32, #tpu.memory_space<smem>>
    %cst_22 = arith.constant 0.000000e+00 : f32
    %31 = vector.broadcast %cst_22 : f32 to vector<8x1024xf32>
    %32 = arith.cmpf ogt, %29, %31 : vector<8x1024xf32>
    %33 = vector.broadcast %30 : f32 to vector<8x1024xf32>
    %34 = arith.mulf %33, %29 : vector<8x1024xf32>
    %35 = arith.select %32, %29, %34 : vector<8x1024xi1>, vector<8x1024xf32>
    %c0_23 = arith.constant 0 : index
    %c0_24 = arith.constant 0 : index
    %c0_25 = arith.constant 0 : index
    %36 = vector.load %arg8[%c0_23, %c0_24, %c0_25] : memref<1x8x1024xf32, #tpu.memory_space<vmem>>, vector<1x8x1024xf32>
    %37 = vector.shape_cast %36 : vector<1x8x1024xf32> to vector<8x1024xf32>
    %38 = vector.shape_cast %35 : vector<8x1024xf32> to vector<1x8x1024xf32>
    tpu.vector_store %arg8[%c0_23, %c0_24, %c0_25], %38 {strides = array<i32>} : memref<1x8x1024xf32, #tpu.memory_space<vmem>>, vector<1x8x1024xf32>,
    return
  }
  func.func @transform_0(%arg0: i32, %arg1: i32) -> (i32, i32, i32) {
    %c0_i32 = arith.constant 0 : i32
    %c0_i32_0 = arith.constant 0 : i32
    %c0_i32_1 = arith.constant 0 : i32
    return %arg0, %c0_i32, %c0_i32_0 : i32, i32, i32
  }
  func.func @transform_1(%arg0: i32, %arg1: i32) -> (i32, i32, i32) {
    %c0_i32 = arith.constant 0 : i32
    %c0_i32_0 = arith.constant 0 : i32
    %c0_i32_1 = arith.constant 0 : i32
    return %arg1, %c0_i32, %c0_i32_0 : i32, i32, i32
  }
  func.func @transform_2(%arg0: i32, %arg1: i32) -> (i32, i32) {
    %c0_i32 = arith.constant 0 : i32
    %c0_i32_0 = arith.constant 0 : i32
    %c0_i32_1 = arith.constant 0 : i32
    return %c0_i32, %c0_i32_0 : i32, i32
  }
  func.func @transform_3(%arg0: i32, %arg1: i32) -> (i32, i32, i32) {
    %c0_i32 = arith.constant 0 : i32
    %c0_i32_0 = arith.constant 0 : i32
    %c0_i32_1 = arith.constant 0 : i32
    %c0_i32_2 = arith.constant 0 : i32
    return %c0_i32, %c0_i32_0, %c0_i32_1 : i32, i32, i32
  }
  func.func @transform_4(%arg0: i32, %arg1: i32) -> (i32, i32) {
    %c0_i32 = arith.constant 0 : i32
    %c0_i32_0 = arith.constant 0 : i32
    %c0_i32_1 = arith.constant 0 : i32
    return %c0_i32, %c0_i32_0 : i32, i32
  }
  func.func @transform_5(%arg0: i32, %arg1: i32) -> (i32, i32) {
    %c0_i32 = arith.constant 0 : i32
    %c0_i32_0 = arith.constant 0 : i32
    %c0_i32_1 = arith.constant 0 : i32
    return %c0_i32, %c0_i32_0 : i32, i32
  }
  func.func @transform_6(%arg0: i32, %arg1: i32) -> (i32, i32, i32) {
    %c0_i32 = arith.constant 0 : i32
    %c0_i32_0 = arith.constant 0 : i32
    return %arg0, %c0_i32, %arg1 : i32, i32, i32
  }
}

</mosaic_0001>

<bundles_post_ra>
// kernel: psp_upsample.1
= control target key start
LH: loop header
LB: loop body
LE: loop exit
PB: predicated region body
PF: predicated region fallthrough
CT: control target
= control target key end

     0   :  { %s7358_s23 = smov 0   ;;  %s7360_s24 = smov 0   ;;  %s9204_s0 = inlined_call_operand.vmem [shape: f32[2,16,64], index: 0, kind: input, shape index: {}]   ;;  %s9205_s1 = inlined_call_operand.vmem [shape: f32[1,34,16], index: 1, kind: input, shape index: {}]   ;;  %s9206_s2 = inlined_call_operand.vmem [shape: f32[16,96], index: 2, kind: input, shape index: {}]   ;;  %s9207_s3 = inlined_call_operand.vmem [shape: f32[3,8,12], index: 3, kind: input, shape index: {}]   ;;  %s9208_s4 = inlined_call_operand.vmem [shape: f32[8,1], index: 4, kind: input, shape index: {}]   ;;  %s9209_s5 = inlined_call_operand.<no memory space> [shape: f32[1,1], index: 5, kind: input, shape index: {}]   ;;  %s9210_s6 = inlined_call_operand.vmem [shape: f32[2,8,1024], index: 6, kind: output, shape index: {}]  }
   0x1   :  { %11 = sst [smem:[#allocation2]] %s9209_s5  ;;  %s7362_s25 = smov 0  }
   0x2 LB: > { %s29_s5 = sadd.s32 1, %s7302_s24  ;;  %p6739_p0 = scmp.ge.s32.totalorder %s7306_s25, 1  ;;  %s7306_s25 = sphi %s7362_s25, %s17_s25   ;;  %s7302_s24 = sphi %s7360_s24, %s9334_s24   ;;  %s7298_s23 = sphi %s7358_s23, %s9333_s23  }
   0x3   : > { %p31_p1 = scmp.ge.s32.totalorder %s29_s5, 2  ;;  %p237_p2 = scmp.lt.s32.totalorder %s7306_s25, 3 }
   0x5   : > { %s9336_s5 = smov (%p31_p1, %s29_s5), 0  ;;  %p238_p3 = pnand %p6739_p0, %p237_p2 }
   0x7   : > { %241 = sbr.rel (%p238_p3) target bundleno = 1452 (0x5ac), region = 44 }
   0xe   : > { %p276_p4 = scmp.lt.s32.totalorder %s7298_s23, 1  ;;  %v9211_v0 = vmov 0.0|0.0   ;;  %vm7309_vm0 = vmmov 0   ;;  %v9212_v1 = vmov 0.0   ;;  %v296_v5 = vld [vmem:[%s9205_s1] sm:$0xff]  ;;  %vm303_vm1 = vcmask 130048  }
   0xf   : > { %7036 = vmatprep.subr.bf16.mxu0 %v9211_v0  ;;  %6952 = vmatprep.mubr.msk.f32.mxu0 %vm7309_vm0, %v9212_v1  ;;  %v297_v6 = vld [vmem:[%s9205_s1 + $0x8] sm:$0xff]  ;;  %v298_v7 = vld [vmem:[%s9205_s1 + $0x10] sm:$0xff]  ;;  %v299_v8 = vld [vmem:[%s9205_s1 + $0x18] sm:$0xff]  ;;  %s7311_s16 = smov 80   ;;  %s7312_s17 = smov 112   ;;  %v464_v25 = vlaneseq  ;;  %vm5400_vm2 = vcmask 261120  }
  0x10   : > { %s9338_s23 = smov (!%p276_p4, %s7298_s23), 1  ;;  %7039 = vmatprep.subr.bf16.mxu1 %v9211_v0  ;;  %6971 = vmatprep.mubr.msk.f32.mxu1 %vm7309_vm0, %v9212_v1  ;;  %v300_v9 = vld [vmem:[%s9205_s1 + $0x20] sm:$0x3]  ;;  %s7313_s18 = smov 96   ;;  %v1381_v21 = vld [vmem:[%s9206_s2 + $0x8] sm:$0xff]  ;;  %vm5403_vm3 = vcmask 523264  }
  0x11   : > { %s6914_s26 = sshll.u32 %s9338_s23, 4  ;;  %v1380_v20 = vld [vmem:[%s9206_s2] sm:$0xff]  ;;  %v7314_v23 = vmov 1983009808   ;;  %v7315_v26 = vmov 1934713408  }
  0x12   : > { %s280_s29 = scalar_lea.vmem %s9204_s0, %s6914_s26  ;;  %v7040_v22 = vpack.c.bf16 %v1381_v21, %v1380_v20  ;;  %v462_v24 = vunpack.c.l.s4 %v7314_v23  ;;  %v494_v27 = vunpack.c.l.s4 %v7315_v26  ;;  %v465_v29 = vshrl.u32 %v464_v25, 7  ;;  %s7316_s26 = smov 64  }
  0x13   : > { %v301_v2 = vld [vmem:[%s280_s29] sm:$0xff]  ;;  %v302_v3 = vld [vmem:[%s280_s29 + $0x8] sm:$0xff]  ;;  %s7317_s27 = smov 32   ;;  %vm5406_vm4 = vcmask 785408   ;;  %vm5458_vm5 = vcmask 1043456   ;;  %vm7319_vm6 = vmmov 1  }
  0x14   : > { %v7037_v4 = vpack.c.bf16 %v302_v3, %v301_v2  ;;  %7041 = vmatpush3.bf16.msra.mxu1 %v7040_v22  ;;  %v463_v28 = vunpack.c.0.s8 %v462_v24  ;;  %v495_v32 = vunpack.c.0.s8 %v494_v27  ;;  %vm8901_vm7 = vmpackc.low %vm5458_vm5, %vm7319_vm6  ;;  %vm5454_vm8 = vcmask 97280   ;;  %s6604_s12 = sld [smem:[#allocation2]]  ;;  %s6915_s13 = sshll.u32 %s9338_s23, 6 }
  0x15   : > { %7118 = vmatprep.subr.bf16.mxu1 %v9211_v0  ;;  %s9156_s23 = scalar_lea.vmem %s9210_s6, %s6915_s13 }
  0x16   : > { %7038 = vmatpush3.bf16.msra.mxu0 %v7037_v4  ;;  %v7449_v33 = vsub.s32 %v463_v28, %v465_v29  ;;  %v7451_v40 = vsub.s32 %v495_v32, %v465_v29 }
  0x19   : > { %6953 = vmatmul.mubr.msk.f32.vlgmr.msra.gmra.mrb[0].mxu0 %vm303_vm1, %v296_v5 }
  0x1a   : > { %6955 = vmatprep.mubr.msk.f32.mxu0 %vm7309_vm0, %v9212_v1 }
  0x1d   : > { %6956 = vmatmul.mubr.msk.f32.gmra.mrb[2].mxu0 %vm303_vm1, %v297_v6 }
  0x1e   : > { %6958 = vmatprep.mubr.msk.f32.mxu0 %vm7309_vm0, %v9212_v1 }
  0x21   : > { %6959 = vmatmul.mubr.msk.f32.gmra.mrb[4].mxu0 %vm303_vm1, %v298_v7 }
  0x22   : > { %6961 = vmatprep.mubr.msk.f32.mxu0 %vm7309_vm0, %v9212_v1 }
  0x25   : > { %6962 = vmatmul.mubr.msk.f32.gmra.mrb[6].mxu0 %vm303_vm1, %v299_v8 }
  0x26   : > { %6964 = vmatprep.mubr.msk.f32.mxu0 %vm7309_vm0, %v9212_v1 }
  0x29   : > { %6965 = vmatmul.mubr.msk.f32.gmra.mrb[8].mxu0 %vm303_vm1, %v300_v9 }
  0x2a   : > { %5547 = vmatprep.mubr.f32.mxu0 %v9212_v1 }
  0xec   : > { %v385_v10 = vpop.f32.mrb[0].mxu0 }
  0xed   : > { %444 = vrot.lane.b32.xlu1 %v385_v10, %s7311_s16  ;;  %414 = vrot.lane.b32.xlu0 %v385_v10, %s7312_s17  ;;  %v6954_v11 = vpop.f32.mrb[1].mxu0 }
  0xf0   : > { %v7417_v12 = vpop.f32.mrb[2].mxu0 }
  0xf1   : > { %429 = vrot.lane.b32.xlu0 %v385_v10, %s7313_s18  ;;  %416 = vrot.lane.b32.xlu1 %v7417_v12, %s7312_s17  ;;  %v6957_v13 = vpop.f32.mrb[3].mxu0 }
  0xf4   : > { %v7421_v14 = vpop.f32.mrb[4].mxu0 }
  0xf5   : > { %431 = vrot.lane.b32.xlu0 %v7417_v12, %s7313_s18  ;;  %446 = vrot.lane.b32.xlu1 %v7417_v12, %s7311_s16  ;;  %v6960_v15 = vpop.f32.mrb[5].mxu0 }
  0xf8   : > { %v7426_v16 = vpop.f32.mrb[6].mxu0 }
  0xf9   : > { %433 = vrot.lane.b32.xlu1 %v7421_v14, %s7313_s18  ;;  %418 = vrot.lane.b32.xlu0 %v7421_v14, %s7312_s17  ;;  %v6963_v17 = vpop.f32.mrb[7].mxu0 }
  0xfc   : > { %v7431_v18 = vpop.f32.mrb[8].mxu0 }
  0xfd   : > { %448 = vrot.lane.b32.xlu0 %v7421_v14, %s7311_s16  ;;  %420 = vrot.lane.b32.xlu1 %v7426_v16, %s7312_s17  ;;  %v6966_v19 = vpop.f32.mrb[9].mxu0 }
 0x101   : > { %435 = vrot.lane.b32.xlu0 %v7426_v16, %s7313_s18  ;;  %450 = vrot.lane.b32.xlu1 %v7426_v16, %s7311_s16 }
 0x105   : > { %437 = vrot.lane.b32.xlu1 %v7431_v18, %s7313_s18  ;;  %422 = vrot.lane.b32.xlu0 %v7431_v18, %s7312_s17 }
 0x109   : > { %452 = vrot.lane.b32.xlu0 %v7431_v18, %s7311_s16 }
 0x15f   : > { %v445_v30 = vpop.permute.xlu1 %444  ;;  %v415_v31 = vpop.permute.xlu0 %414 }
 0x160   : > { %v475_v34 = vcombine.low %v415_v31, %v445_v30  ;;  %v476_v35 = vcombine.high %v415_v31, %v445_v30 }
 0x162   : > { %v483_v41 = vrot.slane %v475_v34, %v7449_v33  ;;  %v490_v42 = vrot.slane %v476_v35, %v7449_v33 }
 0x163   : > { %v430_v36 = vpop.permute.xlu0 %429  ;;  %v417_v37 = vpop.permute.xlu1 %416 }
 0x164   : > { %v459_v38 = vcombine.low %v385_v10, %v430_v36  ;;  %v460_v39 = vcombine.high %v385_v10, %v430_v36 }
 0x166   : > { %v467_v43 = vrot.slane %v459_v38, %v7449_v33  ;;  %v474_v44 = vrot.slane %v460_v39, %v7449_v33 }
 0x167   : > { %v432_v45 = vpop.permute.xlu0 %431  ;;  %v447_v46 = vpop.permute.xlu1 %446 }
 0x168   : > { %v491_v47 = vcombine.low %v467_v43, %v483_v41  ;;  %v492_v48 = vcombine.high %v467_v43, %v483_v41  ;;  %v507_v49 = vcombine.low %v474_v44, %v490_v42  ;;  %v508_v50 = vcombine.high %v474_v44, %v490_v42 }
 0x169   : > { %v527_v51 = vcombine.low %v7417_v12, %v432_v45  ;;  %v528_v52 = vcombine.high %v7417_v12, %v432_v45  ;;  %v543_v53 = vcombine.low %v417_v37, %v447_v46  ;;  %v544_v54 = vcombine.high %v417_v37, %v447_v46 }
 0x16a   : > { %v499_v55 = vrot.slane %v491_v47, %v7451_v40  ;;  %v506_v56 = vrot.slane %v492_v48, %v7451_v40  ;;  %v515_v57 = vrot.slane %v507_v49, %v7451_v40  ;;  %v522_v58 = vrot.slane %v508_v50, %v7451_v40 }
 0x16b   : > { %v535_v59 = vrot.slane %v527_v51, %v7449_v33  ;;  %v542_v60 = vrot.slane %v528_v52, %v7449_v33  ;;  %v551_v61 = vrot.slane %v543_v53, %v7449_v33  ;;  %v558_v62 = vrot.slane %v544_v54, %v7449_v33  ;;  %v434_v63 = vpop.permute.xlu1 %433  ;;  %v419_v2 = vpop.permute.xlu0 %418 }
 0x16c   : > { %v755_v3 = vcombine.low %v499_v55, %v506_v56  ;;  %v6749_v4 = vcombine.high %v499_v55, %v506_v56  ;;  %v771_v5 = vcombine.low %v515_v57, %v522_v58  ;;  %v6750_v6 = vcombine.high %v515_v57, %v522_v58 }
 0x16d   : > { %v559_v7 = vcombine.low %v535_v59, %v551_v61  ;;  %v560_v8 = vcombine.high %v535_v59, %v551_v61  ;;  %v575_v9 = vcombine.low %v542_v60, %v558_v62  ;;  %v576_v10 = vcombine.high %v542_v60, %v558_v62 }
 0x16e   : > { %v762_v11 = vrot.slane %v755_v3, %v7449_v33  ;;  %v770_v12 = vrot.slane %v6749_v4, %v7449_v33  ;;  %v778_v13 = vrot.slane %v771_v5, %v7449_v33  ;;  %v786_v15 = vrot.slane %v6750_v6, %v7449_v33 }
 0x16f   : > { %v567_v17 = vrot.slane %v559_v7, %v7451_v40  ;;  %v574_v19 = vrot.slane %v560_v8, %v7451_v40  ;;  %v583_v20 = vrot.slane %v575_v9, %v7451_v40  ;;  %v590_v21 = vrot.slane %v576_v10, %v7451_v40  ;;  %v449_v22 = vpop.permute.xlu0 %448  ;;  %v421_v27 = vpop.permute.xlu1 %420 }
 0x170   : > { %v787_v23 = vcombine.low %v762_v11, %v770_v12  ;;  %v788_v24 = vcombine.high %v762_v11, %v770_v12  ;;  %v803_v25 = vcombine.low %v778_v13, %v786_v15  ;;  %v804_v26 = vcombine.high %v778_v13, %v786_v15 }
 0x171   : > { %v823_v28 = vcombine.low %v567_v17, %v574_v19  ;;  %v6751_v29 = vcombine.high %v567_v17, %v574_v19  ;;  %v839_v30 = vcombine.low %v583_v20, %v590_v21  ;;  %v6752_v31 = vcombine.high %v583_v20, %v590_v21 }
 0x172   : > { %v7476_v32 = vrot.slane %v787_v23, %v7451_v40  ;;  %v7479_v34 = vrot.slane %v788_v24, %v7451_v40  ;;  %v7482_v35 = vrot.slane %v803_v25, %v7451_v40  ;;  %v7485_v36 = vrot.slane %v804_v26, %v7451_v40 }
 0x173   : > { %v830_v37 = vrot.slane %v823_v28, %v7449_v33  ;;  %v838_v38 = vrot.slane %v6751_v29, %v7449_v33  ;;  %v846_v39 = vrot.slane %v839_v30, %v7449_v33  ;;  %v854_v41 = vrot.slane %v6752_v31, %v7449_v33  ;;  %v436_v50 = vpop.permute.xlu0 %435  ;;  %v451_v55 = vpop.permute.xlu1 %450 }
 0x174   : > { %v595_v42 = vcombine.low %v7421_v14, %v434_v63  ;;  %v596_v43 = vcombine.high %v7421_v14, %v434_v63  ;;  %v611_v44 = vcombine.low %v419_v2, %v449_v22  ;;  %v612_v45 = vcombine.high %v419_v2, %v449_v22 }
 0x175   : > { %v855_v46 = vcombine.low %v830_v37, %v838_v38  ;;  %v856_v47 = vcombine.high %v830_v37, %v838_v38  ;;  %v871_v48 = vcombine.low %v846_v39, %v854_v41  ;;  %v872_v49 = vcombine.high %v846_v39, %v854_v41 }
 0x176   : > { %v603_v51 = vrot.slane %v595_v42, %v7449_v33  ;;  %v610_v52 = vrot.slane %v596_v43, %v7449_v33  ;;  %v619_v53 = vrot.slane %v611_v44, %v7449_v33  ;;  %v626_v54 = vrot.slane %v612_v45, %v7449_v33 }
 0x177   : > { %v7498_v56 = vrot.slane %v855_v46, %v7451_v40  ;;  %v7501_v14 = vrot.slane %v856_v47, %v7451_v40  ;;  %v7504_v57 = vrot.slane %v871_v48, %v7451_v40  ;;  %v7507_v58 = vrot.slane %v872_v49, %v7451_v40  ;;  %v423_v13 = vpop.permute.xlu0 %422  ;;  %v438_v46 = vpop.permute.xlu1 %437 }
 0x178   : > { %v627_v59 = vcombine.low %v603_v51, %v619_v53  ;;  %v628_v60 = vcombine.high %v603_v51, %v619_v53  ;;  %v643_v61 = vcombine.low %v610_v52, %v626_v54  ;;  %v644_v62 = vcombine.high %v610_v52, %v626_v54 }
 0x179   : > { %v663_v63 = vcombine.low %v7426_v16, %v436_v50  ;;  %v664_v2 = vcombine.high %v7426_v16, %v436_v50  ;;  %v679_v3 = vcombine.low %v421_v27, %v451_v55  ;;  %v680_v4 = vcombine.high %v421_v27, %v451_v55 }
 0x17a   : > { %v635_v5 = vrot.slane %v627_v59, %v7451_v40  ;;  %v642_v6 = vrot.slane %v628_v60, %v7451_v40  ;;  %v651_v7 = vrot.slane %v643_v61, %v7451_v40  ;;  %v658_v8 = vrot.slane %v644_v62, %v7451_v40 }
 0x17b   : > { %v671_v9 = vrot.slane %v663_v63, %v7449_v33  ;;  %v678_v10 = vrot.slane %v664_v2, %v7449_v33  ;;  %v687_v11 = vrot.slane %v679_v3, %v7449_v33  ;;  %v694_v12 = vrot.slane %v680_v4, %v7449_v33  ;;  %v453_v47 = vpop.permute.xlu0 %452 }
 0x17c   : > { %v891_v16 = vcombine.low %v635_v5, %v642_v6  ;;  %v6753_v15 = vcombine.high %v635_v5, %v642_v6  ;;  %v907_v17 = vcombine.low %v651_v7, %v658_v8  ;;  %v6754_v19 = vcombine.high %v651_v7, %v658_v8 }
 0x17d   : > { %v695_v20 = vcombine.low %v671_v9, %v687_v11  ;;  %v696_v21 = vcombine.high %v671_v9, %v687_v11  ;;  %v711_v22 = vcombine.low %v678_v10, %v694_v12  ;;  %v712_v23 = vcombine.high %v678_v10, %v694_v12 }
 0x17e   : > { %v898_v24 = vrot.slane %v891_v16, %v7449_v33  ;;  %v906_v25 = vrot.slane %v6753_v15, %v7449_v33  ;;  %v914_v26 = vrot.slane %v907_v17, %v7449_v33  ;;  %v922_v27 = vrot.slane %v6754_v19, %v7449_v33 }
 0x17f   : > { %v703_v28 = vrot.slane %v695_v20, %v7451_v40  ;;  %v710_v29 = vrot.slane %v696_v21, %v7451_v40  ;;  %v719_v30 = vrot.slane %v711_v22, %v7451_v40  ;;  %v726_v31 = vrot.slane %v712_v23, %v7451_v40 }
 0x180   : > { %v923_v37 = vcombine.low %v898_v24, %v906_v25  ;;  %v924_v38 = vcombine.high %v898_v24, %v906_v25  ;;  %v939_v39 = vcombine.low %v914_v26, %v922_v27  ;;  %v940_v41 = vcombine.high %v914_v26, %v922_v27 }
 0x181   : > { %v959_v42 = vcombine.low %v703_v28, %v710_v29  ;;  %v6755_v43 = vcombine.high %v703_v28, %v710_v29  ;;  %v975_v44 = vcombine.low %v719_v30, %v726_v31  ;;  %v6756_v45 = vcombine.high %v719_v30, %v726_v31 }
 0x182   : > { %v7528_v48 = vrot.slane %v923_v37, %v7451_v40  ;;  %v7531_v49 = vrot.slane %v924_v38, %v7451_v40  ;;  %v7534_v50 = vrot.slane %v939_v39, %v7451_v40  ;;  %v7537_v51 = vrot.slane %v940_v41, %v7451_v40 }
 0x183   : > { %v966_v52 = vrot.slane %v959_v42, %v7449_v33  ;;  %v974_v53 = vrot.slane %v6755_v43, %v7449_v33  ;;  %v982_v54 = vrot.slane %v975_v44, %v7449_v33  ;;  %v990_v55 = vrot.slane %v6756_v45, %v7449_v33 }
 0x184   : > { %v731_v59 = vcombine.low %v7431_v18, %v438_v46  ;;  %v739_v60 = vcombine.low %v423_v13, %v453_v47  ;;  %v819_v61 = vcombine.low %v7476_v32, %v7482_v35  ;;  %v6757_v62 = vcombine.low %v7482_v35, %v7482_v35 }
 0x185   : > { %v991_v63 = vcombine.low %v966_v52, %v974_v53  ;;  %v992_v2 = vcombine.high %v966_v52, %v974_v53  ;;  %v1007_v3 = vcombine.low %v982_v54, %v990_v55  ;;  %v1008_v4 = vcombine.high %v982_v54, %v990_v55 }
 0x186   : > { %v738_v5 = vrot.slane %v731_v59, %v7449_v33  ;;  %v746_v6 = vrot.slane %v739_v60, %v7449_v33  ;;  %v1087_v7 = vrot.slane %v819_v61, %v7449_v33  ;;  %v1094_v8 = vrot.slane %v6757_v62, %v7449_v33 }
 0x187   : > { %v7553_v18 = vrot.slane %v991_v63, %v7451_v40  ;;  %v7556_v9 = vrot.slane %v992_v2, %v7451_v40  ;;  %v7559_v10 = vrot.slane %v1007_v3, %v7451_v40  ;;  %v7562_v11 = vrot.slane %v1008_v4, %v7451_v40 }
 0x188   : > { %v747_v12 = vcombine.low %v738_v5, %v746_v6  ;;  %v1095_v13 = vcombine.high %v1087_v7, %v1087_v7  ;;  %v1096_v16 = vcombine.high %v1094_v8, %v1094_v8  ;;  %v887_v15 = vcombine.low %v7498_v56, %v7504_v57 }
 0x189   : > { %v6758_v17 = vcombine.low %v7504_v57, %v7504_v57  ;;  %v955_v19 = vcombine.low %v7528_v48, %v7534_v50  ;;  %v6759_v20 = vcombine.low %v7534_v50, %v7534_v50  ;;  %v1023_v21 = vcombine.low %v7553_v18, %v7559_v10 }
 0x18a   : > { %v754_v22 = vrot.slane %v747_v12, %v7451_v40  ;;  %v1382_v23 = vcombine.low %v1087_v7, %v1095_v13  ;;  %v1383_v24 = vcombine.low %v1094_v8, %v1096_v16  ;;  %v1104_v25 = vrot.slane %v887_v15, %v7449_v33 }
 0x18b   : > { %v1111_v26 = vrot.slane %v6758_v17, %v7449_v33  ;;  %v1121_v27 = vrot.slane %v955_v19, %v7449_v33  ;;  %v1128_v28 = vrot.slane %v6759_v20, %v7449_v33  ;;  %v6760_v29 = vcombine.low %v7559_v10, %v7559_v10 }
 0x18c   : > { %v1033_v30 = vrot.slane %v754_v22, %v7449_v33  ;;  %v1034_v31 = vcombine.high %v754_v22, %v9212_v1  ;;  %v1390_v37 = vrot.slane %v1382_v23, %v7449_v33  ;;  %v1397_v38 = vrot.slane %v1383_v24, %v7449_v33 }
 0x18d   : > { %v1112_v39 = vcombine.high %v1104_v25, %v1104_v25  ;;  %v1113_v41 = vcombine.high %v1111_v26, %v1111_v26  ;;  %v1129_v42 = vcombine.high %v1121_v27, %v1121_v27  ;;  %v1130_v43 = vcombine.high %v1128_v28, %v1128_v28 }
 0x18e   : > { %v1041_v44 = vrot.slane %v1034_v31, %v7449_v33  ;;  %v1398_v45 = vcombine.low %v1390_v37, %v1397_v38  ;;  %v1138_v46 = vrot.slane %v1023_v21, %v7449_v33  ;;  %v1145_v47 = vrot.slane %v6760_v29, %v7449_v33 }
 0x18f   : > { %v1399_v52 = vcombine.low %v1104_v25, %v1112_v39  ;;  %v1400_v53 = vcombine.low %v1111_v26, %v1113_v41  ;;  %v1416_v54 = vcombine.low %v1121_v27, %v1129_v42  ;;  %v1417_v55 = vcombine.low %v1128_v28, %v1130_v43 }
 0x190   : > { %v1042_v59 = vcombine.low %v1033_v30, %v1041_v44  ;;  %v1043_v60 = vcombine.high %v1033_v30, %v1041_v44  ;;  %6972 = vmatmul.mubr.msk.f32.vlgmr.msra.gmra.mrb[0].mxu1 %vm303_vm1, %v1398_v45  ;;  %v1146_v61 = vcombine.high %v1138_v46, %v1138_v46  ;;  %v1147_v62 = vcombine.high %v1145_v47, %v1145_v47 }
 0x191   : > { %6974 = vmatprep.mubr.msk.f32.mxu1 %vm7309_vm0, %v9212_v1  ;;  %v1407_v63 = vrot.slane %v1399_v52, %v7449_v33  ;;  %v1414_v2 = vrot.slane %v1400_v53, %v7449_v33  ;;  %v1424_v3 = vrot.slane %v1416_v54, %v7449_v33  ;;  %v1431_v4 = vrot.slane %v1417_v55, %v7449_v33 }
 0x192   : > { %v1050_v5 = vrot.slane %v1042_v59, %v7451_v40  ;;  %v7597_v6 = vrot.slane %v1043_v60, %v7451_v40  ;;  %v1433_v7 = vcombine.low %v1138_v46, %v1146_v61  ;;  %v1434_v8 = vcombine.low %v1145_v47, %v1147_v62 }
 0x193   : > { %v1415_v12 = vcombine.low %v1407_v63, %v1414_v2  ;;  %v1432_v13 = vcombine.low %v1424_v3, %v1431_v4  ;;  %v820_v16 = vcombine.high %v7476_v32, %v7482_v35  ;;  %v6761_v15 = vcombine.high %v7482_v35, %v7482_v35 }
 0x194   : > { %v1058_v17 = vcombine.high %v1050_v5, %v9212_v1  ;;  %v7606_v19 = vcombine.high %v7597_v6, %v9212_v1  ;;  %v1441_v20 = vrot.slane %v1433_v7, %v7449_v33  ;;  %v1448_v21 = vrot.slane %v1434_v8, %v7449_v33 }
 0x195   : > { %6975 = vmatmul.mubr.msk.f32.gmra.mrb[2].mxu1 %vm303_vm1, %v1415_v12  ;;  %v1154_v22 = vrot.slane %v1050_v5, %v7449_v33  ;;  %v1162_v23 = vrot.slane %v820_v16, %v7449_v33  ;;  %v1169_v32 = vrot.slane %v6761_v15, %v7449_v33  ;;  %v888_v35 = vcombine.high %v7498_v56, %v7504_v57 }
 0x196   : > { %6977 = vmatprep.mubr.msk.f32.mxu1 %vm7309_vm0, %v9212_v1  ;;  %v1449_v24 = vcombine.low %v1441_v20, %v1448_v21  ;;  %v6762_v25 = vcombine.high %v7504_v57, %v7504_v57  ;;  %v956_v26 = vcombine.high %v7528_v48, %v7534_v50  ;;  %v6763_v27 = vcombine.high %v7534_v50, %v7534_v50 }
 0x197   : > { %v1170_v28 = vcombine.high %v1162_v23, %v1162_v23  ;;  %v1450_v29 = vcombine.low %v1154_v22, %v1162_v23  ;;  %v1171_v30 = vcombine.high %v1169_v32, %v1169_v32  ;;  %v1179_v31 = vrot.slane %v888_v35, %v7449_v33 }
 0x198   : > { %v1186_v56 = vrot.slane %v6762_v25, %v7449_v33  ;;  %v1196_v37 = vrot.slane %v956_v26, %v7449_v33  ;;  %v1203_v38 = vrot.slane %v6763_v27, %v7449_v33  ;;  %v1024_v57 = vcombine.high %v7553_v18, %v7559_v10 }
 0x199   : > { %6978 = vmatmul.mubr.msk.f32.gmra.mrb[4].mxu1 %vm303_vm1, %v1432_v13  ;;  %v1451_v48 = vcombine.low %v1170_v28, %v1169_v32  ;;  %v1458_v39 = vrot.slane %v1450_v29, %v7449_v33  ;;  %v1187_v50 = vcombine.high %v1179_v31, %v1179_v31  ;;  %v1467_v41 = vcombine.low %v1171_v30, %v1179_v31 }
 0x19a   : > { %6980 = vmatprep.mubr.msk.f32.mxu1 %vm7309_vm0, %v9212_v1  ;;  %v1188_v42 = vcombine.high %v1186_v56, %v1186_v56  ;;  %v1204_v43 = vcombine.high %v1196_v37, %v1196_v37  ;;  %v1205_v44 = vcombine.high %v1203_v38, %v1203_v38  ;;  %v6764_v45 = vcombine.high %v7559_v10, %v7559_v10 }
 0x19b   : > { %v1465_v46 = vrot.slane %v1451_v48, %v7449_v33  ;;  %v1468_v47 = vcombine.low %v1187_v50, %v1186_v56  ;;  %v1475_v18 = vrot.slane %v1467_v41, %v7449_v33  ;;  %v1213_v52 = vrot.slane %v1024_v57, %v7449_v33 }
 0x19c   : > { %v1484_v53 = vcombine.low %v1188_v42, %v1196_v37  ;;  %v1485_v54 = vcombine.low %v1204_v43, %v1203_v38  ;;  %v1220_v55 = vrot.slane %v6764_v45, %v7449_v33  ;;  %v821_v59 = vcombine.low %v7479_v34, %v7485_v36 }
 0x19d   : > { %6981 = vmatmul.mubr.msk.f32.gmra.mrb[6].mxu1 %vm303_vm1, %v1449_v24  ;;  %v1466_v60 = vcombine.low %v1458_v39, %v1465_v46  ;;  %v1482_v61 = vrot.slane %v1468_v47, %v7449_v33  ;;  %v1221_v10 = vcombine.high %v1213_v52, %v1213_v52  ;;  %v1501_v62 = vcombine.low %v1205_v44, %v1213_v52 }
 0x19e   : > { %6983 = vmatprep.mubr.msk.f32.mxu1 %vm7309_vm0, %v9212_v1  ;;  %v1492_v63 = vrot.slane %v1484_v53, %v7449_v33  ;;  %v1499_v2 = vrot.slane %v1485_v54, %v7449_v33  ;;  %v1222_v3 = vcombine.high %v1220_v55, %v1220_v55  ;;  %v1229_v4 = vrot.slane %v1058_v17, %v7449_v33 }
 0x19f   : > { %v1483_v5 = vcombine.low %v1475_v18, %v1482_v61  ;;  %v1502_v7 = vcombine.low %v1221_v10, %v1220_v55  ;;  %v1509_v8 = vrot.slane %v1501_v62, %v7449_v33  ;;  %v1237_v12 = vrot.slane %v821_v59, %v7449_v33 }
 0x1a0   : > { %v1500_v13 = vcombine.low %v1492_v63, %v1499_v2  ;;  %v1518_v16 = vcombine.low %v1222_v3, %v1229_v4  ;;  %v889_v15 = vcombine.low %v7501_v14, %v7507_v58  ;;  %v6765_v20 = vcombine.low %v7485_v36, %v7485_v36 }
 0x1a1   : > { %6984 = vmatmul.mubr.msk.f32.gmra.mrb[8].mxu1 %vm303_vm1, %v1466_v60  ;;  %v1516_v21 = vrot.slane %v1502_v7, %v7449_v33  ;;  %v1245_v22 = vcombine.high %v1237_v12, %v1237_v12  ;;  %v957_v17 = vcombine.low %v7531_v49, %v7537_v51  ;;  %v6766_v23 = vcombine.low %v7507_v58, %v7507_v58 }
 0x1a2   : > { %6986 = vmatprep.mubr.msk.f32.mxu1 %vm7309_vm0, %v9212_v1  ;;  %v1526_v32 = vrot.slane %v1518_v16, %v7449_v33  ;;  %v1244_v35 = vrot.slane %v6765_v20, %v7449_v33  ;;  %v1254_v24 = vrot.slane %v889_v15, %v7449_v33  ;;  %v1025_v25 = vcombine.low %v7556_v9, %v7562_v11 }
 0x1a3   : > { %v1517_v26 = vcombine.low %v1509_v8, %v1516_v21  ;;  %v1519_v27 = vcombine.low %v1237_v12, %v1245_v22  ;;  %v1261_v28 = vrot.slane %v6766_v23, %v7449_v33  ;;  %v1271_v29 = vrot.slane %v957_v17, %v7449_v33 }
 0x1a4   : > { %v1246_v30 = vcombine.high %v1244_v35, %v1244_v35  ;;  %v1262_v31 = vcombine.high %v1254_v24, %v1254_v24  ;;  %v6767_v56 = vcombine.low %v7537_v51, %v7537_v51  ;;  %v1288_v37 = vrot.slane %v1025_v25, %v7449_v33 }
 0x1a5   : > { %6987 = vmatmul.mubr.msk.f32.gmra.mrb[10].mxu1 %vm303_vm1, %v1483_v5  ;;  %v1533_v38 = vrot.slane %v1519_v27, %v7449_v33  ;;  %v1263_v57 = vcombine.high %v1261_v28, %v1261_v28  ;;  %v1279_v48 = vcombine.high %v1271_v29, %v1271_v29  ;;  %v822_v39 = vcombine.high %v7479_v34, %v7485_v36 }
 0x1a6   : > { %6989 = vmatprep.mubr.msk.f32.mxu1 %vm7309_vm0, %v9212_v1  ;;  %v1535_v50 = vcombine.low %v1244_v35, %v1246_v30  ;;  %v1536_v41 = vcombine.low %v1254_v24, %v1262_v31  ;;  %v1278_v42 = vrot.slane %v6767_v56, %v7449_v33  ;;  %v1296_v43 = vcombine.high %v1288_v37, %v1288_v37 }
 0x1a7   : > { %v1534_v44 = vcombine.low %v1526_v32, %v1533_v38  ;;  %v1552_v45 = vcombine.low %v1261_v28, %v1263_v57  ;;  %v1553_v46 = vcombine.low %v1271_v29, %v1279_v48  ;;  %v6768_v47 = vcombine.low %v7562_v11, %v7562_v11 }
 0x1a8   : > { %v1543_v18 = vrot.slane %v1535_v50, %v7449_v33  ;;  %v1550_v52 = vrot.slane %v1536_v41, %v7449_v33  ;;  %v1280_v53 = vcombine.high %v1278_v42, %v1278_v42  ;;  %v1570_v34 = vcombine.low %v1288_v37, %v1296_v43 }
 0x1a9   : > { %6990 = vmatmul.mubr.msk.f32.gmra.mrb[12].mxu1 %vm303_vm1, %v1500_v13  ;;  %v1560_v54 = vrot.slane %v1552_v45, %v7449_v33  ;;  %v1567_v55 = vrot.slane %v1553_v46, %v7449_v33  ;;  %v1295_v59 = vrot.slane %v6768_v47, %v7449_v33  ;;  %v1304_v60 = vrot.slane %v7597_v6, %v7449_v33 }
 0x1aa   : > { %6992 = vmatprep.mubr.msk.f32.mxu1 %vm7309_vm0, %v9212_v1  ;;  %v1551_v61 = vcombine.low %v1543_v18, %v1550_v52  ;;  %v1569_v10 = vcombine.low %v1278_v42, %v1280_v53  ;;  %v1584_v62 = vrot.slane %v1570_v34, %v7449_v33  ;;  %v1312_v63 = vrot.slane %v822_v39, %v7449_v33 }
 0x1ab   : > { %v1568_v2 = vcombine.low %v1560_v54, %v1567_v55  ;;  %v1297_v3 = vcombine.high %v1295_v59, %v1295_v59  ;;  %v890_v4 = vcombine.high %v7501_v14, %v7507_v58  ;;  %v6769_v5 = vcombine.high %v7485_v36, %v7485_v36 }
 0x1ac   : > { %v1577_v7 = vrot.slane %v1569_v10, %v7449_v33  ;;  %v1587_v6 = vcombine.low %v1304_v60, %v1312_v63  ;;  %v1320_v8 = vcombine.high %v1312_v63, %v1312_v63  ;;  %v958_v12 = vcombine.high %v7531_v49, %v7537_v51 }
 0x1ad   : > { %6993 = vmatmul.mubr.msk.f32.gmra.mrb[14].mxu1 %vm303_vm1, %v1517_v26  ;;  %v1586_v13 = vcombine.low %v1295_v59, %v1297_v3  ;;  %v1319_v16 = vrot.slane %v6769_v5, %v7449_v33  ;;  %v1329_v15 = vrot.slane %v890_v4, %v7449_v33  ;;  %v6770_v14 = vcombine.high %v7507_v58, %v7507_v58 }
 0x1ae   : > { %6995 = vmatprep.mubr.msk.f32.mxu1 %vm7309_vm0, %v9212_v1  ;;  %v1585_v36 = vcombine.low %v1577_v7, %v1584_v62  ;;  %v1601_v20 = vrot.slane %v1587_v6, %v7449_v33  ;;  %v1346_v21 = vrot.slane %v958_v12, %v7449_v33  ;;  %v1026_v49 = vcombine.high %v7556_v9, %v7562_v11 }
 0x1af   : > { %v1594_v22 = vrot.slane %v1586_v13, %v7449_v33  ;;  %v1321_v17 = vcombine.high %v1319_v16, %v1319_v16  ;;  %v1603_v23 = vcombine.low %v1320_v8, %v1319_v16  ;;  %v1336_v32 = vrot.slane %v6770_v14, %v7449_v33 }
 0x1b0   : > { %v1337_v35 = vcombine.high %v1329_v15, %v1329_v15  ;;  %v6771_v58 = vcombine.high %v7537_v51, %v7537_v51  ;;  %v1354_v24 = vcombine.high %v1346_v21, %v1346_v21  ;;  %v1363_v25 = vrot.slane %v1026_v49, %v7449_v33 }
 0x1b1   : > { %6996 = vmatmul.mubr.msk.f32.gmra.mrb[16].mxu1 %vm303_vm1, %v1534_v44  ;;  %v1602_v26 = vcombine.low %v1594_v22, %v1601_v20  ;;  %v1604_v27 = vcombine.low %v1321_v17, %v1329_v15  ;;  %v1338_v28 = vcombine.high %v1336_v32, %v1336_v32  ;;  %v6772_v30 = vcombine.high %v7562_v11, %v7562_v11 }
 0x1b2   : > { %6998 = vmatprep.mubr.msk.f32.mxu1 %vm7309_vm0, %v9212_v1  ;;  %v1620_v9 = vcombine.low %v1337_v35, %v1336_v32  ;;  %v1353_v29 = vrot.slane %v6771_v58, %v7449_v33  ;;  %v1371_v31 = vcombine.high %v1363_v25, %v1363_v25  ;;  %v1611_v51 = vrot.slane %v1603_v23, %v7449_v33 }
 0x1b3   : > { %v1618_v56 = vrot.slane %v1604_v27, %v7449_v33  ;;  %v1621_v37 = vcombine.low %v1338_v28, %v1346_v21  ;;  %v1370_v48 = vrot.slane %v6772_v30, %v7449_v33  ;;  %v1379_v39 = vrot.slane %v7606_v19, %v7449_v33 }
 0x1b4   : > { %v1355_v38 = vcombine.high %v1353_v29, %v1353_v29  ;;  %v1637_v57 = vcombine.low %v1354_v24, %v1353_v29  ;;  %v1628_v41 = vrot.slane %v1620_v9, %v7449_v33 }
 0x1b5   : > { %6999 = vmatmul.mubr.msk.f32.gmra.mrb[18].mxu1 %vm303_vm1, %v1551_v61  ;;  %v1619_v50 = vcombine.low %v1611_v51, %v1618_v56  ;;  %v1635_v11 = vrot.slane %v1621_v37, %v7449_v33  ;;  %v1372_v43 = vcombine.high %v1370_v48, %v1370_v48  ;;  %v1654_v44 = vcombine.low %v1371_v31, %v1370_v48 }
 0x1b6   : > { %7001 = vmatprep.mubr.msk.f32.mxu1 %vm7309_vm0, %v9212_v1  ;;  %v1638_v42 = vcombine.low %v1355_v38, %v1363_v25  ;;  %v1645_v46 = vrot.slane %v1637_v57, %v7449_v33 }
 0x1b7   : > { %v1636_v45 = vcombine.low %v1628_v41, %v1635_v11  ;;  %v1655_v18 = vcombine.low %v1372_v43, %v1379_v39  ;;  %v1662_v52 = vrot.slane %v1654_v44, %v7449_v33 }
 0x1b8   : > { %v1652_v47 = vrot.slane %v1638_v42, %v7449_v33 }
 0x1b9   : > { %7002 = vmatmul.mubr.msk.f32.gmra.mrb[20].mxu1 %vm303_vm1, %v1568_v2  ;;  %v1669_v53 = vrot.slane %v1655_v18, %v7449_v33 }
 0x1ba   : > { %7004 = vmatprep.mubr.msk.f32.mxu1 %vm7309_vm0, %v9212_v1  ;;  %v1653_v19 = vcombine.low %v1645_v46, %v1652_v47 }
 0x1bb   : > { %v1670_v34 = vcombine.low %v1662_v52, %v1669_v53 }
 0x1bd   : > { %7005 = vmatmul.mubr.msk.f32.gmra.mrb[22].mxu1 %vm303_vm1, %v1585_v36 }
 0x1be   : > { %7007 = vmatprep.mubr.msk.f32.mxu1 %vm7309_vm0, %v9212_v1 }
 0x1c1   : > { %7008 = vmatmul.mubr.msk.f32.gmra.mrb[24].mxu1 %vm303_vm1, %v1602_v26 }
 0x1c2   : > { %7010 = vmatprep.mubr.msk.f32.mxu1 %vm7309_vm0, %v9212_v1 }
 0x1c5   : > { %7011 = vmatmul.mubr.msk.f32.gmra.mrb[26].mxu1 %vm303_vm1, %v1619_v50 }
 0x1c6   : > { %7013 = vmatprep.mubr.msk.f32.mxu1 %vm7309_vm0, %v9212_v1 }
 0x1c9   : > { %7014 = vmatmul.mubr.msk.f32.gmra.mrb[28].mxu1 %vm303_vm1, %v1636_v45 }
 0x1ca   : > { %7016 = vmatprep.mubr.msk.f32.mxu1 %vm7309_vm0, %v9212_v1 }
 0x1cd   : > { %7017 = vmatmul.mubr.msk.f32.gmra.mrb[30].mxu1 %vm303_vm1, %v1653_v19 }
 0x1ce   : > { %7019 = vmatprep.mubr.msk.f32.mxu1 %vm7309_vm0, %v9212_v1 }
 0x1d1   : > { %7020 = vmatmul.mubr.msk.f32.gmra.mrb[32].mxu1 %vm303_vm1, %v1670_v34 }
 0x1d2   : > { %7033 = vmatprep.mubr.msk.f32.mxu1 %vm7309_vm0, %v9212_v1 }
 0x263   : > { %v7758_v54 = vpop.f32.mrb[0].mxu1 }
 0x264   : > { %v6973_v55 = vpop.f32.mrb[1].mxu1  ;;  %1872 = vrot.lane.b32.xlu1 %v7758_v54, %s7313_s18  ;;  %1923 = vrot.lane.b32.xlu0 %v7758_v54, %s7316_s26 }
 0x268   : > { %v7764_v59 = vpop.f32.mrb[2].mxu1 }
 0x269   : > { %v6976_v60 = vpop.f32.mrb[3].mxu1  ;;  %1874 = vrot.lane.b32.xlu1 %v7764_v59, %s7313_s18 }
 0x26c   : > { %v7768_v61 = vpop.f32.mrb[4].mxu1 }
 0x26d   : > { %1925 = vrot.lane.b32.xlu1 %v7764_v59, %s7316_s26  ;;  %v6979_v10 = vpop.f32.mrb[5].mxu1 }
 0x270   : > { %v7772_v62 = vpop.f32.mrb[6].mxu1 }
 0x271   : > { %1876 = vrot.lane.b32.xlu1 %v7768_v61, %s7313_s18  ;;  %v6982_v63 = vpop.f32.mrb[7].mxu1 }
 0x274   : > { %v7776_v2 = vpop.f32.mrb[8].mxu1 }
 0x275   : > { %1927 = vrot.lane.b32.xlu1 %v7768_v61, %s7316_s26  ;;  %v6985_v3 = vpop.f32.mrb[9].mxu1 }
 0x278   : > { %v7780_v4 = vpop.f32.mrb[10].mxu1 }
 0x279   : > { %1880 = vrot.lane.b32.xlu1 %v7776_v2, %s7313_s18  ;;  %1933 = vrot.lane.b32.xlu0 %v7780_v4, %s7316_s26  ;;  %v6988_v5 = vpop.f32.mrb[11].mxu1 }
 0x27c   : > { %v7786_v7 = vpop.f32.mrb[12].mxu1 }
 0x27d   : > { %1931 = vrot.lane.b32.xlu1 %v7776_v2, %s7316_s26  ;;  %v6991_v6 = vpop.f32.mrb[13].mxu1 }
 0x280   : > { %v7790_v8 = vpop.f32.mrb[14].mxu1 }
 0x281   : > { %1882 = vrot.lane.b32.xlu1 %v7780_v4, %s7313_s18  ;;  %v6994_v12 = vpop.f32.mrb[15].mxu1 }
 0x284   : > { %v7794_v13 = vpop.f32.mrb[16].mxu1 }
 0x285   : > { %1935 = vrot.lane.b32.xlu1 %v7786_v7, %s7316_s26  ;;  %1888 = vrot.lane.b32.xlu0 %v7794_v13, %s7313_s18  ;;  %v6997_v16 = vpop.f32.mrb[17].mxu1 }
 0x288   : > { %v7800_v15 = vpop.f32.mrb[18].mxu1 }
 0x289   : > { %1884 = vrot.lane.b32.xlu1 %v7786_v7, %s7313_s18  ;;  %1941 = vrot.lane.b32.xlu0 %v7800_v15, %s7316_s26  ;;  %v7000_v14 = vpop.f32.mrb[19].mxu1 }
 0x28c   : > { %v7806_v36 = vpop.f32.mrb[20].mxu1 }
 0x28d   : > { %1937 = vrot.lane.b32.xlu1 %v7790_v8, %s7316_s26  ;;  %1890 = vrot.lane.b32.xlu0 %v7800_v15, %s7313_s18  ;;  %v7003_v20 = vpop.f32.mrb[21].mxu1 }
 0x290   : > { %v7812_v21 = vpop.f32.mrb[22].mxu1 }
 0x291   : > { %1939 = vrot.lane.b32.xlu1 %v7794_v13, %s7316_s26  ;;  %1943 = vrot.lane.b32.xlu0 %v7806_v36, %s7316_s26  ;;  %v7006_v49 = vpop.f32.mrb[23].mxu1 }
 0x294   : > { %v7818_v22 = vpop.f32.mrb[24].mxu1 }
 0x295   : > { %1892 = vrot.lane.b32.xlu0 %v7806_v36, %s7313_s18  ;;  %1947 = vrot.lane.b32.xlu1 %v7818_v22, %s7316_s26  ;;  %v7009_v17 = vpop.f32.mrb[25].mxu1 }
 0x298   : > { %v7824_v23 = vpop.f32.mrb[26].mxu1 }
 0x299   : > { %1945 = vrot.lane.b32.xlu0 %v7812_v21, %s7316_s26  ;;  %1898 = vrot.lane.b32.xlu1 %v7824_v23, %s7313_s18  ;;  %v7012_v32 = vpop.f32.mrb[27].mxu1 }
 0x29c   : > { %v7830_v35 = vpop.f32.mrb[28].mxu1 }
 0x29d   : > { %1896 = vrot.lane.b32.xlu0 %v7818_v22, %s7313_s18  ;;  %1886 = vrot.lane.b32.xlu1 %v7790_v8, %s7313_s18  ;;  %v7015_v58 = vpop.f32.mrb[29].mxu1 }
 0x2a0   : > { %v7836_v24 = vpop.f32.mrb[30].mxu1 }
 0x2a1   : > { %1894 = vrot.lane.b32.xlu0 %v7812_v21, %s7313_s18  ;;  %1878 = vrot.lane.b32.xlu1 %v7772_v62, %s7313_s18  ;;  %v7018_v25 = vpop.f32.mrb[31].mxu1 }
 0x2a4   : > { %v7842_v26 = vpop.f32.mrb[32].mxu1 }
 0x2a5   : > { %1949 = vrot.lane.b32.xlu0 %v7824_v23, %s7316_s26  ;;  %1929 = vrot.lane.b32.xlu1 %v7772_v62, %s7316_s26  ;;  %v7021_v27 = vpop.f32.mrb[33].mxu1 }
 0x2a9   : > { %1900 = vrot.lane.b32.xlu0 %v7830_v35, %s7313_s18 }
 0x2ad   : > { %1951 = vrot.lane.b32.xlu0 %v7830_v35, %s7316_s26 }
 0x2b1   : > { %1902 = vrot.lane.b32.xlu0 %v7836_v24, %s7313_s18 }
 0x2b5   : > { %1953 = vrot.lane.b32.xlu0 %v7836_v24, %s7316_s26 }
 0x2b9   : > { %1904 = vrot.lane.b32.xlu0 %v7842_v26, %s7313_s18 }
 0x2bd   : > { %1955 = vrot.lane.b32.xlu0 %v7842_v26, %s7316_s26 }
 0x2d6   : > { %v1873_v28 = vpop.permute.xlu1 %1872  ;;  %v1924_v9 = vpop.permute.xlu0 %1923 }
 0x2d7   : > { %v1990_v29 = vcombine.high %v1873_v28, %v9212_v1  ;;  %v1974_v30 = vcombine.low %v7758_v54, %v1924_v9  ;;  %v1975_v31 = vcombine.high %v7758_v54, %v1924_v9  ;;  %v1997_v51 = vrot.slane %v1873_v28, %v7449_v33 }
 0x2d9   : > { %v2004_v56 = vrot.slane %v1990_v29, %v7449_v33  ;;  %v1982_v37 = vrot.slane %v1974_v30, %v7449_v33  ;;  %v1989_v38 = vrot.slane %v1975_v31, %v7449_v33 }
 0x2db   : > { %v2005_v57 = vcombine.low %v1982_v37, %v1997_v51  ;;  %v2006_v48 = vcombine.high %v1982_v37, %v1997_v51  ;;  %v2021_v39 = vcombine.low %v1989_v38, %v2004_v56  ;;  %v2022_v50 = vcombine.high %v1989_v38, %v2004_v56  ;;  %v1875_v41 = vpop.permute.xlu1 %1874 }
 0x2dc   : > { %v2057_v45 = vcombine.high %v1875_v41, %v9212_v1  ;;  %v2064_v63 = vrot.slane %v1875_v41, %v7449_v33 }
 0x2dd   : > { %v2013_v11 = vrot.slane %v2005_v57, %v7451_v40  ;;  %v2020_v42 = vrot.slane %v2006_v48, %v7451_v40  ;;  %v2029_v43 = vrot.slane %v2021_v39, %v7451_v40  ;;  %v2036_v44 = vrot.slane %v2022_v50, %v7451_v40 }
 0x2de   : > { %v2071_v3 = vrot.slane %v2057_v45, %v7449_v33 }
 0x2df   : > { %v3109_v46 = vcombine.low %v2013_v11, %v2020_v42  ;;  %v6790_v47 = vcombine.high %v2013_v11, %v2020_v42  ;;  %v3125_v18 = vcombine.low %v2029_v43, %v2036_v44  ;;  %v6791_v19 = vcombine.high %v2029_v43, %v2036_v44  ;;  %v1926_v52 = vpop.permute.xlu1 %1925 }
 0x2e0   : > { %v2041_v53 = vcombine.low %v7764_v59, %v1926_v52  ;;  %v2042_v34 = vcombine.high %v7764_v59, %v1926_v52 }
 0x2e1   : > { %v3116_v54 = vrot.slane %v3109_v46, %v7449_v33  ;;  %v3124_v55 = vrot.slane %v6790_v47, %v7449_v33  ;;  %v3132_v60 = vrot.slane %v3125_v18, %v7449_v33  ;;  %v3140_v10 = vrot.slane %v6791_v19, %v7449_v33 }
 0x2e2   : > { %v2049_v5 = vrot.slane %v2041_v53, %v7449_v33  ;;  %v2056_v6 = vrot.slane %v2042_v34, %v7449_v33 }
 0x2e3   : > { %v3141_v12 = vcombine.low %v3116_v54, %v3124_v55  ;;  %v3142_v16 = vcombine.high %v3116_v54, %v3124_v55  ;;  %v3157_v14 = vcombine.low %v3132_v60, %v3140_v10  ;;  %v3158_v59 = vcombine.high %v3132_v60, %v3140_v10  ;;  %v1877_v20 = vpop.permute.xlu1 %1876 }
 0x2e4   : > { %v2072_v49 = vcombine.low %v2049_v5, %v2064_v63  ;;  %v2073_v17 = vcombine.high %v2049_v5, %v2064_v63  ;;  %v2088_v32 = vcombine.low %v2056_v6, %v2071_v3  ;;  %v2089_v58 = vcombine.high %v2056_v6, %v2071_v3 }
 0x2e5   : > { %v7883_v25 = vrot.slane %v3141_v12, %v7451_v40  ;;  %v7886_v27 = vrot.slane %v3157_v14, %v7451_v40  ;;  %v3172_v28 = vrot.slane %v3158_v59, %v7451_v40  ;;  %v7894_v51 = vrot.slane %v3142_v16, %v7451_v40 }
 0x2e6   : > { %v2080_v9 = vrot.slane %v2072_v49, %v7451_v40  ;;  %v2087_v29 = vrot.slane %v2073_v17, %v7451_v40  ;;  %v2096_v30 = vrot.slane %v2088_v32, %v7451_v40  ;;  %v2103_v31 = vrot.slane %v2089_v58, %v7451_v40 }
 0x2e7   : > { %v2124_v56 = vcombine.high %v1877_v20, %v9212_v1  ;;  %v2131_v37 = vrot.slane %v1877_v20, %v7449_v33  ;;  %v1928_v38 = vpop.permute.xlu1 %1927  ;;  %v6823_v57 = vcombine.low %v7886_v27, %v3172_v28 }
 0x2e8   : > { %v3176_v48 = vcombine.low %v2080_v9, %v2087_v29  ;;  %v6792_v39 = vcombine.high %v2080_v9, %v2087_v29  ;;  %v3192_v50 = vcombine.low %v2096_v30, %v2103_v31  ;;  %v6793_v41 = vcombine.high %v2096_v30, %v2103_v31 }
 0x2e9   : > { %v2138_v11 = vrot.slane %v2124_v56, %v7449_v33  ;;  %v2108_v42 = vcombine.low %v7768_v61, %v1928_v38  ;;  %v2109_v43 = vcombine.high %v7768_v61, %v1928_v38  ;;  %v7911_v34 = vrot.slane %v6823_v57, %v7449_v33 }
 0x2ea   : > { %v3183_v45 = vrot.slane %v3176_v48, %v7449_v33  ;;  %v3191_v46 = vrot.slane %v6792_v39, %v7449_v33  ;;  %v3199_v47 = vrot.slane %v3192_v50, %v7449_v33  ;;  %v3207_v18 = vrot.slane %v6793_v41, %v7449_v33 }
 0x2eb   : > { %v2116_v19 = vrot.slane %v2108_v42, %v7449_v33  ;;  %v2123_v52 = vrot.slane %v2109_v43, %v7449_v33  ;;  %v1881_v53 = vpop.permute.xlu1 %1880  ;;  %v1934_v28 = vpop.permute.xlu0 %1933 }
 0x2ec   : > { %v3208_v54 = vcombine.low %v3183_v45, %v3191_v46  ;;  %v3209_v55 = vcombine.high %v3183_v45, %v3191_v46  ;;  %v3224_v60 = vcombine.low %v3199_v47, %v3207_v18  ;;  %v3225_v10 = vcombine.high %v3199_v47, %v3207_v18 }
 0x2ed   : > { %v2139_v63 = vcombine.low %v2116_v19, %v2131_v37  ;;  %v2140_v3 = vcombine.high %v2116_v19, %v2131_v37  ;;  %v2155_v5 = vcombine.low %v2123_v52, %v2138_v11  ;;  %v2156_v6 = vcombine.high %v2123_v52, %v2138_v11 }
 0x2ee   : > { %v7916_v12 = vrot.slane %v3208_v54, %v7451_v40  ;;  %v7919_v16 = vrot.slane %v3209_v55, %v7451_v40  ;;  %v7922_v14 = vrot.slane %v3224_v60, %v7451_v40  ;;  %v7925_v59 = vrot.slane %v3225_v10, %v7451_v40 }
 0x2ef   : > { %v2147_v20 = vrot.slane %v2139_v63, %v7451_v40  ;;  %v2154_v49 = vrot.slane %v2140_v3, %v7451_v40  ;;  %v2163_v17 = vrot.slane %v2155_v5, %v7451_v40  ;;  %v2170_v32 = vrot.slane %v2156_v6, %v7451_v40  ;;  %v1932_v58 = vpop.permute.xlu1 %1931 }
 0x2f0   : > { %v2258_v9 = vcombine.high %v1881_v53, %v9212_v1  ;;  %v2265_v29 = vrot.slane %v1881_v53, %v7449_v33  ;;  %v2242_v30 = vcombine.low %v7776_v2, %v1932_v58  ;;  %v2243_v31 = vcombine.high %v7776_v2, %v1932_v58 }
 0x2f1   : > { %v3243_v56 = vcombine.low %v2147_v20, %v2154_v49  ;;  %v6794_v37 = vcombine.high %v2147_v20, %v2154_v49  ;;  %v3259_v38 = vcombine.low %v2163_v17, %v2170_v32  ;;  %v6795_v57 = vcombine.high %v2163_v17, %v2170_v32 }
 0x2f2   : > { %v2272_v48 = vrot.slane %v2258_v9, %v7449_v33  ;;  %v2250_v39 = vrot.slane %v2242_v30, %v7449_v33  ;;  %v2257_v50 = vrot.slane %v2243_v31, %v7449_v33  ;;  %v2308_v41 = vcombine.low %v7780_v4, %v1934_v28 }
 0x2f3   : > { %v3250_v11 = vrot.slane %v3243_v56, %v7449_v33  ;;  %v3258_v42 = vrot.slane %v6794_v37, %v7449_v33  ;;  %v3266_v43 = vrot.slane %v3259_v38, %v7449_v33  ;;  %v3274_v2 = vrot.slane %v6795_v57, %v7449_v33  ;;  %v1883_v45 = vpop.permute.xlu1 %1882 }
 0x2f4   : > { %v2273_v46 = vcombine.low %v2250_v39, %v2265_v29  ;;  %v2274_v47 = vcombine.high %v2250_v39, %v2265_v29  ;;  %v2289_v18 = vcombine.low %v2257_v50, %v2272_v48  ;;  %v2290_v19 = vcombine.high %v2257_v50, %v2272_v48 }
 0x2f5   : > { %v3275_v52 = vcombine.low %v3250_v11, %v3258_v42  ;;  %v3276_v53 = vcombine.high %v3250_v11, %v3258_v42  ;;  %v3291_v54 = vcombine.low %v3266_v43, %v3274_v2  ;;  %v3292_v55 = vcombine.high %v3266_v43, %v3274_v2 }
 0x2f6   : > { %v2281_v60 = vrot.slane %v2273_v46, %v7451_v40  ;;  %v2288_v10 = vrot.slane %v2274_v47, %v7451_v40  ;;  %v2297_v63 = vrot.slane %v2289_v18, %v7451_v40  ;;  %v2304_v3 = vrot.slane %v2290_v19, %v7451_v40 }
 0x2f7   : > { %v7948_v5 = vrot.slane %v3275_v52, %v7451_v40  ;;  %v7951_v6 = vrot.slane %v3276_v53, %v7451_v40  ;;  %v7954_v20 = vrot.slane %v3291_v54, %v7451_v40  ;;  %v7957_v49 = vrot.slane %v3292_v55, %v7451_v40  ;;  %v1936_v17 = vpop.permute.xlu1 %1935 }
 0x2f8   : > { %v3383_v32 = vrot.slane %v2281_v60, %v7449_v33  ;;  %v3384_v58 = vcombine.high %v2281_v60, %v9212_v1  ;;  %v3409_v9 = vcombine.low %v2288_v10, %v2297_v63  ;;  %v6798_v29 = vcombine.high %v2288_v10, %v2297_v63 }
 0x2f9   : > { %9241 = vst [vmem:[#allocation3_spill] sm:$0xff] %v7948_v5  ;;  %9242 = vst [vmem:[#allocation4_spill] sm:$0xff] %v7951_v6  ;;  %v2309_v30 = vcombine.high %v7780_v4, %v1934_v28  ;;  %v2316_v31 = vrot.slane %v2308_v41, %v7449_v33  ;;  %v2324_v56 = vcombine.high %v1883_v45, %v9212_v1  ;;  %v1889_v28 = vpop.permute.xlu0 %1888 }
 0x2fa   : > { %9243 = vst [vmem:[#allocation5_spill] sm:$0xff] %v7954_v20  ;;  %9244 = vst [vmem:[#allocation6_spill] sm:$0xff] %v7957_v49  ;;  %v2331_v37 = vrot.slane %v1883_v45, %v7449_v33  ;;  %v3391_v38 = vrot.slane %v3384_v58, %v7449_v33  ;;  %v3416_v57 = vrot.slane %v3409_v9, %v7449_v33 }
 0x2fb   : > { %v3424_v48 = vrot.slane %v6798_v29, %v7449_v33  ;;  %v2375_v39 = vcombine.low %v7786_v7, %v1936_v17  ;;  %v2323_v50 = vrot.slane %v2309_v30, %v7449_v33  ;;  %v2338_v11 = vrot.slane %v2324_v56, %v7449_v33  ;;  %v1885_v52 = vpop.permute.xlu1 %1884 }
 0x2fc   : > { %v2339_v42 = vcombine.low %v2316_v31, %v2331_v37  ;;  %v2340_v4 = vcombine.high %v2316_v31, %v2331_v37  ;;  %v3392_v41 = vcombine.low %v3383_v32, %v3391_v38  ;;  %v3393_v43 = vcombine.high %v3383_v32, %v3391_v38 }
 0x2fd   : > { %v3441_v2 = vcombine.low %v3416_v57, %v3424_v48  ;;  %v3442_v46 = vcombine.high %v3416_v57, %v3424_v48  ;;  %v2355_v18 = vcombine.low %v2323_v50, %v2338_v11  ;;  %v2356_v19 = vcombine.high %v2323_v50, %v2338_v11  ;;  %v1942_v48 = vpop.permute.xlu0 %1941 }
 0x2fe   : > { %v2347_v45 = vrot.slane %v2339_v42, %v7451_v40  ;;  %v2354_v47 = vrot.slane %v2340_v4, %v7451_v40  ;;  %v7974_v53 = vrot.slane %v3392_v41, %v7451_v40  ;;  %v7977_v54 = vrot.slane %v3393_v43, %v7451_v40 }
 0x2ff   : > { %v7980_v55 = vrot.slane %v3441_v2, %v7451_v40  ;;  %v7983_v60 = vrot.slane %v3442_v46, %v7451_v40  ;;  %v2363_v10 = vrot.slane %v2355_v18, %v7451_v40  ;;  %v2370_v63 = vrot.slane %v2356_v19, %v7451_v40  ;;  %v1938_v41 = vpop.permute.xlu1 %1937 }
 0x300   : > { %9245 = vst [vmem:[#allocation7_spill] sm:$0xff] %v7974_v53  ;;  %9246 = vst [vmem:[#allocation8_spill] sm:$0xff] %v7977_v54  ;;  %v3425_v32 = vcombine.low %v2304_v3, %v2347_v45  ;;  %v6799_v58 = vcombine.high %v2304_v3, %v2347_v45  ;;  %v7989_v9 = vcombine.high %v7974_v53, %v9212_v1 }
 0x301   : > { %v2376_v29 = vcombine.high %v7786_v7, %v1936_v17  ;;  %v2383_v30 = vrot.slane %v2375_v39, %v7449_v33  ;;  %v2391_v31 = vcombine.high %v1885_v52, %v9212_v1  ;;  %v3476_v38 = vcombine.low %v2354_v47, %v2363_v10 }
 0x302   : > { %9247 = vst [vmem:[#allocation9_spill] sm:$0xff] %v7989_v9  ;;  %v3432_v56 = vrot.slane %v3425_v32, %v7449_v33  ;;  %v3440_v37 = vrot.slane %v6799_v58, %v7449_v33  ;;  %v6800_v57 = vcombine.high %v2354_v47, %v2363_v10  ;;  %v2398_v3 = vrot.slane %v1885_v52, %v7449_v33 }
 0x303   : > { %v2390_v50 = vrot.slane %v2376_v29, %v7449_v33  ;;  %v2405_v11 = vrot.slane %v2391_v31, %v7449_v33  ;;  %v2525_v42 = vcombine.high %v1889_v28, %v9212_v1  ;;  %v3483_v39 = vrot.slane %v3476_v38, %v7449_v33  ;;  %v1891_v38 = vpop.permute.xlu0 %1890 }
 0x304   : > { %v3457_v7 = vcombine.low %v3432_v56, %v3440_v37  ;;  %v3458_v17 = vcombine.high %v3432_v56, %v3440_v37  ;;  %v3491_v4 = vrot.slane %v6800_v57, %v7449_v33  ;;  %v2406_v43 = vcombine.low %v2383_v30, %v2398_v3 }
 0x305   : > { %v2407_v2 = vcombine.high %v2383_v30, %v2398_v3  ;;  %v2422_v46 = vcombine.low %v2390_v50, %v2405_v11  ;;  %v2423_v45 = vcombine.high %v2390_v50, %v2405_v11  ;;  %v2532_v37 = vrot.slane %v1889_v28, %v7449_v33 }
 0x306   : > { %v8003_v47 = vrot.slane %v3457_v7, %v7451_v40  ;;  %v8006_v18 = vrot.slane %v3458_v17, %v7451_v40  ;;  %v3508_v19 = vcombine.low %v3483_v39, %v3491_v4  ;;  %v3509_v52 = vcombine.high %v3483_v39, %v3491_v4 }
 0x307   : > { %v2414_v10 = vrot.slane %v2406_v43, %v7451_v40  ;;  %v2421_v32 = vrot.slane %v2407_v2, %v7451_v40  ;;  %v2430_v58 = vrot.slane %v2422_v46, %v7451_v40  ;;  %v8012_v29 = vrot.slane %v2423_v45, %v7451_v40  ;;  %v1940_v43 = vpop.permute.xlu1 %1939 }
 0x308   : > { %v8017_v31 = vrot.slane %v3508_v19, %v7451_v40  ;;  %v8020_v56 = vrot.slane %v3509_v52, %v7451_v40  ;;  %v2539_v7 = vrot.slane %v2525_v42, %v7449_v33  ;;  %v2442_v17 = vcombine.low %v7790_v8, %v1938_v41 }
 0x309   : > { %v3492_v57 = vcombine.low %v2370_v63, %v2414_v10  ;;  %v6801_v50 = vcombine.high %v2370_v63, %v2414_v10  ;;  %v3543_v3 = vcombine.low %v2421_v32, %v2430_v58  ;;  %v6802_v11 = vcombine.high %v2421_v32, %v2430_v58 }
 0x30a   : > { %v2443_v39 = vcombine.high %v7790_v8, %v1938_v41  ;;  %v2575_v4 = vcombine.low %v7800_v15, %v1942_v48  ;;  %v8032_v63 = vrot.slane %v2442_v17, %v7449_v33  ;;  %v2576_v19 = vcombine.high %v7800_v15, %v1942_v48 }
 0x30b   : > { %v3499_v2 = vrot.slane %v3492_v57, %v7449_v33  ;;  %v3507_v46 = vrot.slane %v6801_v50, %v7449_v33  ;;  %v3550_v28 = vrot.slane %v3543_v3, %v7449_v33  ;;  %v3558_v45 = vrot.slane %v6802_v11, %v7449_v33  ;;  %v8043_v11 = vpop.permute.xlu0 %1943  ;;  %v8045_v17 = vpop.permute.xlu1 %1947 }
 0x30c   : > { %v8035_v42 = vrot.slane %v2443_v39, %v7449_v33  ;;  %v2583_v8 = vrot.slane %v2575_v4, %v7449_v33  ;;  %v2590_v58 = vrot.slane %v2576_v19, %v7449_v33  ;;  %v2509_v57 = vcombine.low %v7794_v13, %v1940_v43 }
 0x30d   : > { %v3524_v41 = vcombine.low %v3499_v2, %v3507_v46  ;;  %v3525_v52 = vcombine.high %v3499_v2, %v3507_v46  ;;  %v3575_v10 = vcombine.low %v3550_v28, %v3558_v45  ;;  %v3576_v32 = vcombine.high %v3550_v28, %v3558_v45 }
 0x30e   : > { %v2510_v50 = vcombine.high %v7794_v13, %v1940_v43  ;;  %v2591_v3 = vcombine.high %v1891_v38, %v9212_v1  ;;  %v2517_v13 = vrot.slane %v2509_v57, %v7449_v33  ;;  %v2598_v2 = vrot.slane %v1891_v38, %v7449_v33 }
 0x30f   : > { %v8048_v15 = vrot.slane %v3524_v41, %v7451_v40  ;;  %v8051_v48 = vrot.slane %v3525_v52, %v7451_v40  ;;  %v8054_v39 = vrot.slane %v3575_v10, %v7451_v40  ;;  %v8057_v4 = vrot.slane %v3576_v32, %v7451_v40 }
 0x310   : > { %v2524_v43 = vrot.slane %v2510_v50, %v7449_v33  ;;  %v2605_v46 = vrot.slane %v2591_v3, %v7449_v33  ;;  %v2642_v45 = vcombine.low %v7806_v36, %v8043_v11  ;;  %v2643_v19 = vcombine.high %v7806_v36, %v8043_v11 }
 0x311   : > { %9248 = vst [vmem:[#allocation10_spill] sm:$0xff] %v8057_v4  ;;  %v2776_v41 = vcombine.low %v7818_v22, %v8045_v17  ;;  %v2540_v52 = vcombine.low %v2517_v13, %v2532_v37  ;;  %v2541_v10 = vcombine.high %v2517_v13, %v2532_v37  ;;  %v2606_v50 = vcombine.low %v2583_v8, %v2598_v2 }
 0x312   : > { %v2556_v32 = vcombine.low %v2524_v43, %v2539_v7  ;;  %v2557_v57 = vcombine.high %v2524_v43, %v2539_v7  ;;  %v2607_v38 = vcombine.high %v2583_v8, %v2598_v2  ;;  %v2622_v0 = vcombine.low %v2590_v58, %v2605_v46 }
 0x313   : > { %v2623_v3 = vcombine.high %v2590_v58, %v2605_v46  ;;  %v8072_v44 = vrot.slane %v2540_v52, %v7451_v40  ;;  %v2555_v28 = vrot.slane %v2541_v10, %v7451_v40  ;;  %v2614_v11 = vrot.slane %v2606_v50, %v7451_v40 }
 0x314   : > { %v2564_v61 = vrot.slane %v2556_v32, %v7451_v40  ;;  %v2571_v36 = vrot.slane %v2557_v57, %v7451_v40  ;;  %v2621_v30 = vrot.slane %v2607_v38, %v7451_v40  ;;  %v2630_v37 = vrot.slane %v2622_v0, %v7451_v40  ;;  %v1893_v32 = vpop.permute.xlu0 %1892  ;;  %v1899_v57 = vpop.permute.xlu1 %1898 }
 0x315   : > { %v2637_v7 = vrot.slane %v2623_v3, %v7451_v40  ;;  %v3683_v8 = vrot.slane %v2555_v28, %v7449_v33  ;;  %v3684_v58 = vcombine.high %v2555_v28, %v9212_v1  ;;  %v2650_v3 = vrot.slane %v2642_v45, %v7449_v33 }
 0x316   : > { %v3709_v13 = vcombine.low %v2564_v61, %v2571_v36  ;;  %v6806_v43 = vcombine.high %v2564_v61, %v2571_v36  ;;  %v3725_v2 = vcombine.low %v2614_v11, %v2621_v30  ;;  %v6807_v46 = vcombine.high %v2614_v11, %v2621_v30 }
 0x317   : > { %v3776_v52 = vcombine.low %v2630_v37, %v2637_v7  ;;  %v6808_v10 = vcombine.high %v2630_v37, %v2637_v7  ;;  %v3691_v50 = vrot.slane %v3684_v58, %v7449_v33 }
 0x318   : > { %v3716_v38 = vrot.slane %v3709_v13, %v7449_v33  ;;  %v3724_v0 = vrot.slane %v6806_v43, %v7449_v33  ;;  %v3732_v9 = vrot.slane %v3725_v2, %v7449_v33  ;;  %v3740_v28 = vrot.slane %v6807_v46, %v7449_v33 }
 0x319   : > { %v3783_v61 = vrot.slane %v3776_v52, %v7449_v33  ;;  %v3791_v30 = vrot.slane %v6808_v10, %v7449_v33  ;;  %v3692_v36 = vcombine.low %v3683_v8, %v3691_v50  ;;  %v3693_v11 = vcombine.high %v3683_v8, %v3691_v50  ;;  %v1946_v50 = vpop.permute.xlu0 %1945 }
 0x31a   : > { %v3741_v37 = vcombine.low %v3716_v38, %v3724_v0  ;;  %v3742_v7 = vcombine.high %v3716_v38, %v3724_v0  ;;  %v3757_v1 = vcombine.low %v3732_v9, %v3740_v28  ;;  %v3758_v58 = vcombine.high %v3732_v9, %v3740_v28  ;;  %v1887_v38 = vpop.permute.xlu1 %1886 }
 0x31b   : > { %v3808_v53 = vcombine.low %v3783_v61, %v3791_v30  ;;  %v3809_v13 = vcombine.high %v3783_v61, %v3791_v30  ;;  %v8092_v43 = vrot.slane %v3692_v36, %v7451_v40  ;;  %v8095_v45 = vrot.slane %v3693_v11, %v7451_v40 }
 0x31c   : > { %v8098_v2 = vrot.slane %v3741_v37, %v7451_v40  ;;  %v8101_v46 = vrot.slane %v3742_v7, %v7451_v40  ;;  %v8104_v8 = vrot.slane %v3757_v1, %v7451_v40  ;;  %v8107_v52 = vrot.slane %v3758_v58, %v7451_v40 }
 0x31d   : > { %9249 = vst [vmem:[#allocation11_spill] sm:$0xff] %v8092_v43  ;;  %9250 = vst [vmem:[#allocation12_spill] sm:$0xff] %v8095_v45  ;;  %v8110_v9 = vrot.slane %v3808_v53, %v7451_v40  ;;  %v8113_v10 = vrot.slane %v3809_v13, %v7451_v40  ;;  %v9251_v0 = vmov 0.0   ;;  %v2657_v61 = vrot.slane %v2643_v19, %v7449_v33 }
 0x31e   : > { %v8117_v28 = vcombine.high %v8092_v43, %v9251_v0  ;;  %v2777_v1 = vcombine.high %v7818_v22, %v8045_v17  ;;  %v8123_v30 = vrot.slane %v2776_v41, %v7449_v33  ;;  %v2658_v53 = vcombine.high %v1893_v32, %v9251_v0 }
 0x31f   : > { %v2665_v36 = vrot.slane %v1893_v32, %v7449_v33  ;;  %v2858_v11 = vcombine.high %v1899_v57, %v9251_v0  ;;  %v8129_v37 = vrot.slane %v1899_v57, %v7449_v33  ;;  %v2709_v19 = vcombine.low %v7812_v21, %v1946_v50 }
 0x320   : > { %9252 = vst [vmem:[#allocation13_spill] sm:$0xff] %v8117_v28  ;;  %v8132_v7 = vrot.slane %v2777_v1, %v7449_v33  ;;  %v2710_v58 = vcombine.high %v7812_v21, %v1946_v50  ;;  %v2458_v22 = vcombine.high %v1887_v38, %v9251_v0  ;;  %v2672_v17 = vrot.slane %v2658_v53, %v7449_v33 }
 0x321   : > { %v2673_v41 = vcombine.low %v2650_v3, %v2665_v36  ;;  %v2674_v13 = vcombine.high %v2650_v3, %v2665_v36  ;;  %v8139_v32 = vrot.slane %v2858_v11, %v7449_v33  ;;  %v8142_v45 = vrot.slane %v2709_v19, %v7449_v33 }
 0x322   : > { %v8145_v57 = vrot.slane %v2710_v58, %v7449_v33  ;;  %v2465_v1 = vrot.slane %v1887_v38, %v7449_v33  ;;  %v2472_v28 = vrot.slane %v2458_v22, %v7449_v33  ;;  %v2689_v53 = vcombine.low %v2657_v61, %v2672_v17  ;;  %v1897_v58 = vpop.permute.xlu0 %1896 }
 0x323   : > { %v2681_v21 = vrot.slane %v2673_v41, %v7451_v40  ;;  %v2688_v50 = vrot.slane %v2674_v13, %v7451_v40  ;;  %v2690_v43 = vcombine.high %v2657_v61, %v2672_v17 }
 0x324   : > { %v2473_v3 = vcombine.low %v8032_v63, %v2465_v1  ;;  %v2474_v36 = vcombine.high %v8032_v63, %v2465_v1  ;;  %v2489_v11 = vcombine.low %v8035_v42, %v2472_v28  ;;  %v2490_v19 = vcombine.high %v8035_v42, %v2472_v28 }
 0x325   : > { %v2697_v54 = vrot.slane %v2689_v53, %v7451_v40  ;;  %v2704_v38 = vrot.slane %v2690_v43, %v7451_v40  ;;  %v3792_v22 = vcombine.low %v2681_v21, %v2688_v50  ;;  %v6809_v6 = vcombine.high %v2681_v21, %v2688_v50 }
 0x326   : > { %v2481_v41 = vrot.slane %v2473_v3, %v7451_v40  ;;  %v2488_v13 = vrot.slane %v2474_v36, %v7451_v40  ;;  %v2497_v61 = vrot.slane %v2489_v11, %v7451_v40  ;;  %v2504_v17 = vrot.slane %v2490_v19, %v7451_v40 }
 0x327   : > { %v3799_v63 = vrot.slane %v3792_v22, %v7449_v33  ;;  %v3807_v1 = vrot.slane %v6809_v6, %v7449_v33  ;;  %v3843_v42 = vcombine.low %v2697_v54, %v2704_v38  ;;  %v6810_v28 = vcombine.high %v2697_v54, %v2704_v38  ;;  %v1895_v38 = vpop.permute.xlu0 %1894 }
 0x328   : > { %v3559_v53 = vcombine.low %v8012_v29, %v2481_v41  ;;  %v6803_v43 = vcombine.high %v8012_v29, %v2481_v41  ;;  %v3610_v5 = vcombine.low %v2488_v13, %v2497_v61  ;;  %v6804_v21 = vcombine.high %v2488_v13, %v2497_v61  ;;  %v1879_v61 = vpop.permute.xlu1 %1878 }
 0x329   : > { %v3824_v50 = vcombine.low %v3799_v63, %v3807_v1  ;;  %v3825_v3 = vcombine.high %v3799_v63, %v3807_v1  ;;  %v3850_v36 = vrot.slane %v3843_v42, %v7449_v33  ;;  %v3858_v11 = vrot.slane %v6810_v28, %v7449_v33 }
 0x32a   : > { %v3566_v19 = vrot.slane %v3559_v53, %v7449_v33  ;;  %v3574_v22 = vrot.slane %v6803_v43, %v7449_v33  ;;  %v3617_v6 = vrot.slane %v3610_v5, %v7449_v33  ;;  %v3625_v54 = vrot.slane %v6804_v21, %v7449_v33 }
 0x32b   : > { %v8172_v20 = vrot.slane %v3824_v50, %v7451_v40  ;;  %v8175_v29 = vrot.slane %v3825_v3, %v7451_v40  ;;  %v3875_v41 = vcombine.low %v3850_v36, %v3858_v11  ;;  %v3876_v13 = vcombine.high %v3850_v36, %v3858_v11 }
 0x32c   : > { %v3591_v63 = vcombine.low %v3566_v19, %v3574_v22  ;;  %v3592_v1 = vcombine.high %v3566_v19, %v3574_v22  ;;  %v3626_v42 = vcombine.low %v2504_v17, %v8072_v44  ;;  %v6805_v28 = vcombine.high %v2504_v17, %v8072_v44 }
 0x32d   : > { %v8180_v5 = vrot.slane %v3875_v41, %v7451_v40  ;;  %v8183_v53 = vrot.slane %v3876_v13, %v7451_v40  ;;  %v3642_v43 = vcombine.low %v3617_v6, %v3625_v54  ;;  %v3643_v21 = vcombine.high %v3617_v6, %v3625_v54 }
 0x32e   : > { %v8186_v50 = vrot.slane %v3591_v63, %v7451_v40  ;;  %v8189_v3 = vrot.slane %v3592_v1, %v7451_v40  ;;  %v3633_v36 = vrot.slane %v3626_v42, %v7449_v33  ;;  %v3641_v11 = vrot.slane %v6805_v28, %v7449_v33  ;;  %v8204_v63 = vpop.permute.xlu0 %1949 }
 0x32f   : > { %9253 = vst [vmem:[#allocation14_spill] sm:$0xff] %v8180_v5  ;;  %9254 = vst [vmem:[#allocation15_spill] sm:$0xff] %v8183_v53  ;;  %v8194_v44 = vrot.slane %v3642_v43, %v7451_v40  ;;  %v8197_v17 = vrot.slane %v3643_v21, %v7451_v40  ;;  %v2792_v19 = vcombine.high %v1897_v58, %v9251_v0  ;;  %v1930_v21 = vpop.permute.xlu1 %1929 }
 0x330   : > { %9255 = vst [vmem:[#allocation16_spill] sm:$0xff] %v8189_v3  ;;  %v2799_v22 = vrot.slane %v1897_v58, %v7449_v33  ;;  %v3658_v54 = vcombine.low %v3633_v36, %v3641_v11  ;;  %v3659_v41 = vcombine.high %v3633_v36, %v3641_v11  ;;  %v2191_v13 = vcombine.high %v1879_v61, %v9251_v0 }
 0x331   : > { %9256 = vst [vmem:[#allocation17_spill] sm:$0xff] %v8194_v44  ;;  %9257 = vst [vmem:[#allocation18_spill] sm:$0xff] %v8197_v17  ;;  %v2806_v1 = vrot.slane %v2792_v19, %v7449_v33  ;;  %v8210_v43 = vrot.slane %v1879_v61, %v7449_v33  ;;  %v2725_v11 = vcombine.high %v1895_v38, %v9251_v0 }
 0x332   : > { %v2807_v42 = vcombine.low %v8123_v30, %v2799_v22  ;;  %v2808_v28 = vcombine.high %v8123_v30, %v2799_v22  ;;  %v8213_v58 = vrot.slane %v3658_v54, %v7451_v40  ;;  %v8216_v6 = vrot.slane %v3659_v41, %v7451_v40 }
 0x333   : > { %v8219_v36 = vrot.slane %v2191_v13, %v7449_v33  ;;  %v2823_v30 = vcombine.low %v8132_v7, %v2806_v1  ;;  %v2824_v61 = vcombine.high %v8132_v7, %v2806_v1  ;;  %v2732_v54 = vrot.slane %v1895_v38, %v7449_v33  ;;  %v1901_v38 = vpop.permute.xlu0 %1900 }
 0x334   : > { %9258 = vst [vmem:[#allocation19_spill] sm:$0xff] %v8213_v58  ;;  %9259 = vst [vmem:[#allocation20_spill] sm:$0xff] %v8216_v6  ;;  %v2815_v19 = vrot.slane %v2807_v42, %v7451_v40  ;;  %v2822_v44 = vrot.slane %v2808_v28, %v7451_v40  ;;  %v2739_v41 = vrot.slane %v2725_v11, %v7449_v33 }
 0x335   : > { %v2175_v13 = vcombine.low %v7772_v62, %v1930_v21  ;;  %v2831_v58 = vrot.slane %v2823_v30, %v7451_v40  ;;  %v8233_v3 = vrot.slane %v2824_v61, %v7451_v40  ;;  %v2740_v4 = vcombine.low %v8142_v45, %v2732_v54 }
 0x336   : > { %v3926_v42 = vcombine.low %v2815_v19, %v2822_v44  ;;  %v6813_v28 = vcombine.high %v2815_v19, %v2822_v44  ;;  %v2741_v7 = vcombine.high %v8142_v45, %v2732_v54  ;;  %v2756_v1 = vcombine.low %v8145_v57, %v2739_v41 }
 0x337   : > { %v2757_v22 = vcombine.high %v8145_v57, %v2739_v41  ;;  %v3983_v30 = vrot.slane %v2831_v58, %v7449_v33  ;;  %v3984_v61 = vcombine.high %v2831_v58, %v9251_v0  ;;  %v2748_v17 = vrot.slane %v2740_v4, %v7451_v40 }
 0x338   : > { %v3933_v11 = vrot.slane %v3926_v42, %v7449_v33  ;;  %v3941_v6 = vrot.slane %v6813_v28, %v7449_v33  ;;  %v2755_v44 = vrot.slane %v2741_v7, %v7451_v40  ;;  %v2764_v19 = vrot.slane %v2756_v1, %v7451_v40 }
 0x339   : > { %v2771_v45 = vrot.slane %v2757_v22, %v7451_v40  ;;  %v3991_v57 = vrot.slane %v3984_v61, %v7449_v33  ;;  %v2176_v41 = vcombine.high %v7772_v62, %v1930_v21  ;;  %v8259_v21 = vpop.permute.xlu0 %1951 }
 0x33a   : > { %v3958_v54 = vcombine.low %v3933_v11, %v3941_v6  ;;  %v3959_v49 = vcombine.high %v3933_v11, %v3941_v6  ;;  %v3859_v42 = vcombine.low %v2748_v17, %v2755_v44  ;;  %v6811_v28 = vcombine.high %v2748_v17, %v2755_v44 }
 0x33b   : > { %v3910_v53 = vcombine.low %v2764_v19, %v2771_v45  ;;  %v6812_v5 = vcombine.high %v2764_v19, %v2771_v45  ;;  %v3992_v7 = vcombine.low %v3983_v30, %v3991_v57  ;;  %v3993_v1 = vcombine.high %v3983_v30, %v3991_v57 }
 0x33c   : > { %v8250_v58 = vrot.slane %v3958_v54, %v7451_v40  ;;  %v8253_v4 = vrot.slane %v3959_v49, %v7451_v40  ;;  %v3866_v22 = vrot.slane %v3859_v42, %v7449_v33  ;;  %v3874_v6 = vrot.slane %v6811_v28, %v7449_v33 }
 0x33d   : > { %v3917_v11 = vrot.slane %v3910_v53, %v7449_v33  ;;  %v3925_v62 = vrot.slane %v6812_v5, %v7449_v33  ;;  %v8262_v17 = vrot.slane %v3992_v7, %v7451_v40  ;;  %v8265_v61 = vrot.slane %v3993_v1, %v7451_v40 }
 0x33e   : > { %9260 = vst [vmem:[#allocation21_spill] sm:$0xff] %v8250_v58  ;;  %9261 = vst [vmem:[#allocation22_spill] sm:$0xff] %v8253_v4  ;;  %v2183_v49 = vrot.slane %v2175_v13, %v7449_v33  ;;  %v2190_v30 = vrot.slane %v2176_v41, %v7449_v33  ;;  %v3891_v44 = vcombine.low %v3866_v22, %v3874_v6 }
 0x33f   : > { %9262 = vst [vmem:[#allocation23_spill] sm:$0xff] %v8262_v17  ;;  %9263 = vst [vmem:[#allocation24_spill] sm:$0xff] %v8265_v61  ;;  %v3892_v19 = vcombine.high %v3866_v22, %v3874_v6  ;;  %v3942_v45 = vcombine.low %v3917_v11, %v3925_v62  ;;  %v3943_v54 = vcombine.high %v3917_v11, %v3925_v62 }
 0x340   : > { %v8271_v53 = vcombine.high %v8262_v17, %v9251_v0  ;;  %v2206_v5 = vcombine.low %v2183_v49, %v8210_v43  ;;  %v2207_v57 = vcombine.high %v2183_v49, %v8210_v43  ;;  %v2222_v42 = vcombine.low %v2190_v30, %v8219_v36 }
 0x341   : > { %v8277_v28 = vrot.slane %v3891_v44, %v7451_v40  ;;  %v8280_v13 = vrot.slane %v3892_v19, %v7451_v40  ;;  %v8283_v41 = vrot.slane %v3942_v45, %v7451_v40  ;;  %v8286_v7 = vrot.slane %v3943_v54, %v7451_v40  ;;  %v1903_v19 = vpop.permute.xlu0 %1902 }
 0x342   : > { %9264 = vst [vmem:[#allocation25_spill] sm:$0xff] %v8271_v53  ;;  %v2214_v1 = vrot.slane %v2206_v5, %v7451_v40  ;;  %v2221_v22 = vrot.slane %v2207_v57, %v7451_v40  ;;  %v2223_v43 = vcombine.high %v2190_v30, %v8219_v36  ;;  %v2230_v6 = vrot.slane %v2222_v42, %v7451_v40 }
 0x343   : > { %9265 = vst [vmem:[#allocation26_spill] sm:$0xff] %v8283_v41  ;;  %9266 = vst [vmem:[#allocation27_spill] sm:$0xff] %v8286_v7  ;;  %v2842_v11 = vcombine.low %v7824_v23, %v8204_v63  ;;  %v2843_v62 = vcombine.high %v7824_v23, %v8204_v63  ;;  %v2925_v49 = vcombine.high %v1901_v38, %v9251_v0 }
 0x344   : > { %v2932_v44 = vrot.slane %v1901_v38, %v7449_v33  ;;  %v2237_v45 = vrot.slane %v2223_v43, %v7451_v40  ;;  %v3310_v54 = vcombine.low %v2214_v1, %v2221_v22  ;;  %v6796_v5 = vcombine.high %v2214_v1, %v2221_v22 }
 0x345   : > { %v2909_v36 = vcombine.low %v7830_v35, %v8259_v21  ;;  %v2850_v30 = vrot.slane %v2842_v11, %v7449_v33  ;;  %v2857_v57 = vrot.slane %v2843_v62, %v7449_v33  ;;  %v2939_v42 = vrot.slane %v2925_v49, %v7449_v33 }
 0x346   : > { %v2910_v23 = vcombine.high %v7830_v35, %v8259_v21  ;;  %v3317_v63 = vrot.slane %v3310_v54, %v7449_v33  ;;  %v3325_v38 = vrot.slane %v6796_v5, %v7449_v33  ;;  %v3326_v61 = vcombine.low %v2230_v6, %v2237_v45  ;;  %v1954_v5 = vpop.permute.xlu0 %1953 }
 0x347   : > { %v6797_v43 = vcombine.high %v2230_v6, %v2237_v45  ;;  %v2873_v1 = vcombine.low %v2850_v30, %v8129_v37  ;;  %v2874_v22 = vcombine.high %v2850_v30, %v8129_v37  ;;  %v2889_v53 = vcombine.low %v2857_v57, %v8139_v32 }
 0x348   : > { %v2890_v11 = vcombine.high %v2857_v57, %v8139_v32  ;;  %v3333_v62 = vrot.slane %v3326_v61, %v7449_v33  ;;  %v3342_v17 = vcombine.low %v3317_v63, %v3325_v38  ;;  %v3343_v35 = vcombine.high %v3317_v63, %v3325_v38 }
 0x349   : > { %v3341_v49 = vrot.slane %v6797_v43, %v7449_v33  ;;  %v2881_v21 = vrot.slane %v2873_v1, %v7451_v40  ;;  %v2888_v54 = vrot.slane %v2874_v22, %v7451_v40  ;;  %v2897_v6 = vrot.slane %v2889_v53, %v7451_v40 }
 0x34a   : > { %v2904_v45 = vrot.slane %v2890_v11, %v7451_v40  ;;  %v8319_v37 = vrot.slane %v3342_v17, %v7451_v40  ;;  %v8322_v32 = vrot.slane %v3343_v35, %v7451_v40  ;;  %v2917_v17 = vrot.slane %v2909_v36, %v7449_v33 }
 0x34b   : > { %v3358_v61 = vcombine.low %v3333_v62, %v3341_v49  ;;  %v3359_v30 = vcombine.high %v3333_v62, %v3341_v49  ;;  %v4009_v57 = vcombine.low %v8233_v3, %v2881_v21  ;;  %v6814_v63 = vcombine.high %v8233_v3, %v2881_v21 }
 0x34c   : > { %9267 = vst [vmem:[#allocation28_spill] sm:$0xff] %v8319_v37  ;;  %9268 = vst [vmem:[#allocation29_spill] sm:$0xff] %v8322_v32  ;;  %v4025_v38 = vcombine.low %v2888_v54, %v2897_v6  ;;  %v6815_v43 = vcombine.high %v2888_v54, %v2897_v6  ;;  %v2924_v22 = vrot.slane %v2910_v23, %v7449_v33 }
 0x34d   : > { %v8327_v1 = vrot.slane %v3358_v61, %v7451_v40  ;;  %v8330_v53 = vrot.slane %v3359_v30, %v7451_v40  ;;  %v8335_v11 = vrot.slane %v4009_v57, %v7449_v33  ;;  %v8338_v62 = vrot.slane %v6814_v63, %v7449_v33  ;;  %v1905_v57 = vpop.permute.xlu0 %1904 }
 0x34e   : > { %v8341_v3 = vrot.slane %v4025_v38, %v7449_v33  ;;  %v8344_v49 = vrot.slane %v6815_v43, %v7449_v33  ;;  %v2940_v35 = vcombine.low %v2917_v17, %v2932_v44  ;;  %v2941_v21 = vcombine.high %v2917_v17, %v2932_v44 }
 0x34f   : > { %9269 = vst [vmem:[#allocation30_spill] sm:$0xff] %v8327_v1  ;;  %9270 = vst [vmem:[#allocation31_spill] sm:$0xff] %v8330_v53  ;;  %v2956_v54 = vcombine.low %v2924_v22, %v2939_v42  ;;  %v2957_v6 = vcombine.high %v2924_v22, %v2939_v42  ;;  %v2992_v17 = vcombine.high %v1903_v19, %v9251_v0 }
 0x350   : > { %v4057_v61 = vcombine.low %v8341_v3, %v8344_v49  ;;  %v2948_v63 = vrot.slane %v2940_v35, %v7451_v40  ;;  %v2955_v38 = vrot.slane %v2941_v21, %v7451_v40  ;;  %v2999_v22 = vrot.slane %v1903_v19, %v7449_v33 }
 0x351   : > { %v2964_v44 = vrot.slane %v2956_v54, %v7451_v40  ;;  %v2971_v42 = vrot.slane %v2957_v6, %v7451_v40  ;;  %v2976_v23 = vcombine.low %v7836_v24, %v1954_v5  ;;  %v3006_v35 = vrot.slane %v2992_v17, %v7449_v33 }
 0x352   : > { %v8359_v43 = vrot.slane %v4057_v61, %v7451_v40  ;;  %v4076_v36 = vcombine.low %v2904_v45, %v2948_v63  ;;  %v6816_v30 = vcombine.high %v2904_v45, %v2948_v63  ;;  %v2977_v21 = vcombine.high %v7836_v24, %v1954_v5 }
 0x353   : > { %v4092_v32 = vcombine.low %v2955_v38, %v2964_v44  ;;  %v6817_v37 = vcombine.high %v2955_v38, %v2964_v44  ;;  %v2984_v54 = vrot.slane %v2976_v23, %v7449_v33  ;;  %v3059_v6 = vcombine.high %v1905_v57, %v9251_v0  ;;  %v1956_v23 = vpop.permute.xlu0 %1955 }
 0x354   : > { %v8369_v61 = vrot.slane %v4076_v36, %v7449_v33  ;;  %v8372_v1 = vrot.slane %v6816_v30, %v7449_v33  ;;  %v2991_v63 = vrot.slane %v2977_v21, %v7449_v33  ;;  %v3066_v5 = vrot.slane %v1905_v57, %v7449_v33 }
 0x355   : > { %v8375_v19 = vrot.slane %v4092_v32, %v7449_v33  ;;  %v8378_v45 = vrot.slane %v6817_v37, %v7449_v33  ;;  %v3007_v38 = vcombine.low %v2984_v54, %v2999_v22  ;;  %v3008_v24 = vcombine.high %v2984_v54, %v2999_v22 }
 0x356   : > { %v3023_v22 = vcombine.low %v2991_v63, %v3006_v35  ;;  %v3024_v21 = vcombine.high %v2991_v63, %v3006_v35  ;;  %v3073_v54 = vrot.slane %v3059_v6, %v7449_v33  ;;  %v3043_v36 = vcombine.low %v7842_v26, %v1956_v23 }
 0x357   : > { %v4124_v32 = vcombine.low %v8375_v19, %v8378_v45  ;;  %v3015_v44 = vrot.slane %v3007_v38, %v7451_v40  ;;  %v3022_v17 = vrot.slane %v3008_v24, %v7451_v40  ;;  %v3044_v30 = vcombine.high %v7842_v26, %v1956_v23 }
 0x358   : > { %v3031_v53 = vrot.slane %v3023_v22, %v7451_v40  ;;  %v3038_v7 = vrot.slane %v3024_v21, %v7451_v40  ;;  %v3051_v38 = vrot.slane %v3043_v36, %v7449_v33  ;;  %v3473_v35 = vcombine.low %v7980_v55, %v8003_v47 }
 0x359   : > { %v8393_v57 = vrot.slane %v4124_v32, %v7451_v40  ;;  %v4143_v37 = vcombine.low %v2971_v42, %v3015_v44  ;;  %v6818_v4 = vcombine.high %v2971_v42, %v3015_v44  ;;  %v3058_v24 = vrot.slane %v3044_v30, %v7449_v33 }
 0x35a   : > { %v3773_v6 = vcombine.low %v8098_v2, %v8104_v8  ;;  %v4159_v23 = vcombine.low %v3022_v17, %v3031_v53  ;;  %v6819_v32 = vcombine.high %v3022_v17, %v3031_v53  ;;  %v3074_v22 = vcombine.low %v3051_v38, %v3066_v5 }
 0x35b   : > { %v8407_v63 = vrot.slane %v4143_v37, %v7449_v33  ;;  %v8410_v26 = vrot.slane %v6818_v4, %v7449_v33  ;;  %v3075_v42 = vcombine.high %v3051_v38, %v3066_v5  ;;  %v3090_v44 = vcombine.low %v3058_v24, %v3073_v54 }
 0x35c   : > { %v3091_v36 = vcombine.high %v3058_v24, %v3073_v54  ;;  %v8413_v30 = vrot.slane %v4159_v23, %v7449_v33  ;;  %v8416_v21 = vrot.slane %v6819_v32, %v7449_v33  ;;  %v3082_v4 = vrot.slane %v3074_v22, %v7451_v40 }
 0x35d   : > { %9271 = vst [vmem:[#allocation32_spill] sm:$0xff] %v8410_v26  ;;  %v3089_v53 = vrot.slane %v3075_v42, %v7451_v40  ;;  %v3098_v5 = vrot.slane %v3090_v44, %v7451_v40  ;;  %v3775_v24 = vcombine.low %v8101_v46, %v8107_v52  ;;  %v9272_v23 = vcombine.high %v8341_v3, %v8344_v49 }
 0x35e   : > { %v3105_v17 = vrot.slane %v3091_v36, %v7451_v40  ;;  %v4191_v54 = vcombine.low %v8413_v30, %v8416_v21  ;;  %v4210_v22 = vcombine.low %v3038_v7, %v3082_v4  ;;  %v6820_v42 = vcombine.high %v3038_v7, %v3082_v4 }
 0x35f   : > { %v4072_v32 = vrot.slane %v9272_v23, %v7451_v40  ;;  %v4226_v37 = vcombine.low %v3089_v53, %v3098_v5  ;;  %v6821_v44 = vcombine.high %v3089_v53, %v3098_v5  ;;  %v6825_v38 = vcombine.high %v7886_v27, %v3473_v35 }
 0x360   : > { %v8437_v36 = vrot.slane %v4191_v54, %v7451_v40  ;;  %v4283_v41 = vrot.slane %v3105_v17, %v7449_v33  ;;  %v4284_v58 = vcombine.high %v3105_v17, %v9251_v0  ;;  %v8443_v52 = vrot.slane %v4210_v22, %v7449_v33 }
 0x361   : > { %v8446_v26 = vrot.slane %v6820_v42, %v7449_v33  ;;  %v8449_v3 = vrot.slane %v4226_v37, %v7449_v33  ;;  %v8452_v7 = vrot.slane %v6821_v44, %v7449_v33  ;;  %v4340_v4 = vrot.slane %v6825_v38, %v7449_v33 }
 0x362   : > { %9273 = vst [vmem:[#allocation33_spill] sm:$0xff] %v8443_v52  ;;  %v4291_v49 = vrot.slane %v4284_v58, %v7449_v33  ;;  %v6827_v53 = vcombine.high %v8003_v47, %v3773_v6  ;;  %v9275_v35 = vcombine.low %v7983_v60, %v8006_v18  ;;  %v6831_v44 = vcombine.high %v3775_v24, %v8359_v43 }
 0x363   : > { %9274 = vst [vmem:[#allocation34_spill] sm:$0xff] %v8446_v26  ;;  %v4258_v54 = vcombine.low %v8449_v3, %v8452_v7  ;;  %v4390_v42 = vcombine.high %v7911_v34, %v4340_v4  ;;  %v3774_v24 = vcombine.high %v8098_v2, %v8104_v8 }
 0x364   : > { %v6829_v5 = vcombine.high %v9275_v35, %v8104_v8  ;;  %v4292_v38 = vcombine.low %v4283_v41, %v4291_v49  ;;  %v4293_v23 = vcombine.high %v4283_v41, %v4291_v49  ;;  %v4356_v6 = vrot.slane %v6827_v53, %v7449_v33 }
 0x365   : > { %v8472_v18 = vrot.slane %v4258_v54, %v7451_v40  ;;  %v6833_v35 = vcombine.low %v8359_v43, %v4072_v32  ;;  %v3474_v49 = vcombine.high %v7980_v55, %v8003_v47  ;;  %v4404_v53 = vrot.slane %v4390_v42, %v7451_v40 }
 0x366   : > { %v4372_v22 = vrot.slane %v6829_v5, %v7449_v33  ;;  %v8478_v37 = vrot.slane %v4292_v38, %v7451_v40  ;;  %v8481_v17 = vrot.slane %v4293_v23, %v7451_v40  ;;  %v4460_v5 = vrot.slane %v6831_v44, %v7449_v33 }
 0x367   : > { %v4476_v54 = vrot.slane %v6833_v35, %v7449_v33  ;;  %v9279_v23 = vcombine.low %v8335_v11, %v8338_v62  ;;  %v9280_v42 = vcombine.high %v8335_v11, %v8338_v62  ;;  %v9281_v8 = vcombine.low %v7883_v25, %v7894_v51 }
 0x368   : > { %9276 = vst [vmem:[#allocation35_spill] sm:$0xff] %v8478_v37  ;;  %9277 = vst [vmem:[#allocation36_spill] sm:$0xff] %v8481_v17  ;;  %v4422_v41 = vcombine.high %v4356_v6, %v4372_v22  ;;  %v8492_v32 = vcombine.high %v8478_v37, %v9251_v0  ;;  %v6826_v17 = vcombine.low %v3474_v49, %v8098_v2 }
 0x369   : > { %v4049_v47 = vrot.slane %v9279_v23, %v7451_v40  ;;  %v4056_v44 = vrot.slane %v9280_v42, %v7451_v40  ;;  %v4494_v35 = vcombine.high %v4460_v5, %v4476_v54  ;;  %v4317_v58 = vrot.slane %v9281_v8, %v7449_v33 }
 0x36a   : > { %9278 = vst [vmem:[#allocation37_spill] sm:$0xff] %v8492_v32  ;;  %v4436_v38 = vrot.slane %v4422_v41, %v7451_v40  ;;  %v9282_v41 = vcombine.high %v7883_v25, %v7886_v27  ;;  %v6828_v26 = vcombine.low %v7983_v60, %v3774_v24  ;;  %v4349_v51 = vrot.slane %v6826_v17, %v7449_v33 }
 0x36b   : > { %v4074_v23 = vcombine.high %v4049_v47, %v8359_v43  ;;  %v6832_v11 = vcombine.low %v4049_v47, %v4056_v44  ;;  %v4508_v62 = vrot.slane %v4494_v35, %v7451_v40  ;;  %v4389_v8 = vcombine.low %v7911_v34, %v4340_v4 }
 0x36c   : > { %v6824_v37 = vcombine.low %v9282_v41, %v7980_v55  ;;  %v4443_v32 = vcombine.low %v4404_v53, %v4436_v38  ;;  %v4365_v52 = vrot.slane %v6828_v26, %v7449_v33  ;;  %v4421_v55 = vcombine.low %v4356_v6, %v4372_v22 }
 0x36d   : > { %v6830_v25 = vcombine.low %v8101_v46, %v4074_v23  ;;  %v4469_v27 = vrot.slane %v6832_v11, %v7449_v33  ;;  %v8522_v60 = vrot.slane %v4389_v8, %v7451_v40  ;;  %v4493_v49 = vcombine.low %v4460_v5, %v4476_v54 }
 0x36e   : > { %v4333_v42 = vrot.slane %v6824_v37, %v7449_v33  ;;  %v7158_v2 = vpack.i.bf16 %v4508_v62, %v4443_v32  ;;  %v4406_v24 = vcombine.high %v4349_v51, %v4365_v52  ;;  %v8526_v17 = vrot.slane %v4421_v55, %v7451_v40 }
 0x36f   : > { %v4453_v37 = vrot.slane %v6830_v25, %v7449_v33  ;;  %v8531_v26 = vrot.slane %v4493_v49, %v7451_v40  ;;  %v4405_v4 = vcombine.low %v4349_v51, %v4365_v52  ;;  %v4444_v6 = vcombine.high %v4404_v53, %v4436_v38 }
 0x370   : > { %v4374_v43 = vcombine.high %v4317_v58, %v4333_v42  ;;  %v4373_v34 = vcombine.low %v4317_v58, %v4333_v42  ;;  %7159 = vrot.lane.b32.xlu1 %v7158_v2, %s7316_s26  ;;  %v4420_v22 = vrot.slane %v4406_v24, %v7451_v40  ;;  %v4441_v5 = vcombine.low %v8522_v60, %v8526_v17 }
 0x371   : > { %v4478_v32 = vcombine.high %v4453_v37, %v4469_v27  ;;  %v4442_v54 = vcombine.high %v8522_v60, %v8526_v17  ;;  %v4511_v58 = vcombine.high %v8531_v26, %v9251_v0  ;;  %v8544_v44 = vrot.slane %v4405_v4, %v7451_v40 }
 0x372   : > { %v4388_v46 = vrot.slane %v4374_v43, %v7451_v40  ;;  %v8541_v47 = vrot.slane %v4373_v34, %v7451_v40  ;;  %v4477_v52 = vcombine.low %v4453_v37, %v4469_v27  ;;  %v4512_v35 = vcombine.high %v4508_v62, %v9251_v0 }
 0x373   : > { %v4492_v38 = vrot.slane %v4478_v32, %v7451_v40  ;;  %v7163_v23 = vpack.i.bf16 %v4511_v58, %v4442_v54  ;;  %v3540_v55 = vcombine.low %v8017_v31, %v8048_v15  ;;  %v3840_v2 = vcombine.low %v8110_v9, %v8172_v20 }
 0x374   : > { %v4439_v53 = vcombine.low %v4388_v46, %v4420_v22  ;;  %v4440_v41 = vcombine.high %v4388_v46, %v4420_v22  ;;  %v4437_v11 = vcombine.low %v8541_v47, %v8544_v44  ;;  %v4438_v42 = vcombine.high %v8541_v47, %v8544_v44 }
 0x375   : > { %v8553_v51 = vrot.slane %v4477_v52, %v7451_v40  ;;  %v7173_v25 = vpack.i.bf16 %v4512_v35, %v4444_v6  ;;  %v4510_v27 = vcombine.high %v4492_v38, %v9251_v0  ;;  %7164 = vrot.lane.b32.xlu1 %v7163_v23, %s7317_s27  ;;  %v3842_v43 = vcombine.low %v8113_v10, %v8175_v29 }
 0x376   : > { %v7168_v8 = vpack.i.bf16 %v4492_v38, %v4439_v53  ;;  %v9283_v49 = vcombine.high %v8375_v19, %v8378_v45  ;;  %v6835_v34 = vcombine.low %v7922_v14, %v7925_v59  ;;  %v6837_v46 = vcombine.high %v7922_v14, %v3540_v55 }
 0x377   : > { %v4509_v62 = vcombine.high %v8553_v51, %v9251_v0  ;;  %v7183_v37 = vpack.i.bf16 %v4510_v27, %v4440_v41  ;;  %v9284_v4 = vcombine.low %v8020_v56, %v8051_v48  ;;  %v6839_v29 = vcombine.high %v8048_v15, %v3840_v2 }
 0x378   : > { %v4139_v24 = vrot.slane %v9283_v49, %v7451_v40  ;;  %7169 = vrot.lane.b32.xlu0 %v7168_v8, %s7316_s26  ;;  %v6843_v32 = vcombine.high %v3842_v43, %v8393_v57  ;;  %v4528_v45 = vrot.slane %v6835_v34, %v7449_v33  ;;  %v4544_v54 = vrot.slane %v6837_v46, %v7449_v33 }
 0x379   : > { %v6841_v6 = vcombine.high %v9284_v4, %v8172_v20  ;;  %v7178_v22 = vpack.i.bf16 %v4509_v62, %v4438_v42  ;;  %v3241_v58 = vcombine.high %v7916_v12, %v7922_v14  ;;  %7174 = vrot.lane.b32.xlu1 %v7173_v25, %s7313_s18  ;;  %v4560_v48 = vrot.slane %v6839_v29, %v7449_v33 }
 0x37a   : > { %v6845_v19 = vcombine.low %v8393_v57, %v4139_v24  ;;  %v4664_v52 = vrot.slane %v6843_v32, %v7449_v33  ;;  %v3541_v38 = vcombine.high %v8017_v31, %v8048_v15  ;;  %v4594_v35 = vcombine.high %v4528_v45, %v4544_v54 }
 0x37b   : > { %v4576_v59 = vrot.slane %v6841_v6, %v7449_v33  ;;  %v3841_v41 = vcombine.high %v8110_v9, %v8172_v20  ;;  %v9285_v14 = vcombine.low %v8369_v61, %v8372_v1  ;;  %v9286_v42 = vcombine.high %v8369_v61, %v8372_v1 }
 0x37c   : > { %v4680_v53 = vrot.slane %v6845_v19, %v7449_v33  ;;  %7179 = vrot.lane.b32.xlu0 %v7178_v22, %s7317_s27  ;;  %v6834_v15 = vcombine.low %v7916_v12, %v7919_v16  ;;  %v6836_v55 = vcombine.low %v3241_v58, %v8017_v31  ;;  %v4608_v62 = vrot.slane %v4594_v35, %v7451_v40 }
 0x37d   : > { %v4116_v23 = vrot.slane %v9285_v14, %v7451_v40  ;;  %v4123_v8 = vrot.slane %v9286_v42, %v7451_v40  ;;  %v4626_v25 = vcombine.high %v4560_v48, %v4576_v59  ;;  %v6838_v2 = vcombine.low %v3541_v38, %v8110_v9 }
 0x37e   : > { %v4698_v27 = vcombine.high %v4664_v52, %v4680_v53  ;;  %v6840_v43 = vcombine.low %v8020_v56, %v3841_v41  ;;  %v4521_v61 = vrot.slane %v6834_v15, %v7449_v33  ;;  %v4537_v24 = vrot.slane %v6836_v55, %v7449_v33 }
 0x37f   : > { %v4141_v20 = vcombine.high %v4116_v23, %v8393_v57  ;;  %v4640_v49 = vrot.slane %v4626_v25, %v7451_v40  ;;  %v4553_v12 = vrot.slane %v6838_v2, %v7449_v33  ;;  %v6844_v57 = vcombine.low %v4116_v23, %v4123_v8 }
 0x380   : > { %v4712_v1 = vrot.slane %v4698_v27, %v7451_v40  ;;  %7184 = vrot.lane.b32.xlu0 %v7183_v37, %s7313_s18  ;;  %v4569_v16 = vrot.slane %v6840_v43, %v7449_v33  ;;  %v4578_v34 = vcombine.high %v4521_v61, %v4537_v24  ;;  %v4593_v56 = vcombine.low %v4528_v45, %v4544_v54 }
 0x381   : > { %v6842_v31 = vcombine.low %v8113_v10, %v4141_v20  ;;  %v4647_v9 = vcombine.low %v4608_v62, %v4640_v49  ;;  %v4625_v46 = vcombine.low %v4560_v48, %v4576_v59  ;;  %v4673_v22 = vrot.slane %v6844_v57, %v7449_v33  ;;  %v9288_v57 = vld [vmem:[#allocation15_spill] sm:$0xff] }
 0x382   : > { %v4610_v4 = vcombine.high %v4553_v12, %v4569_v16  ;;  %v4697_v29 = vcombine.low %v4664_v52, %v4680_v53  ;;  %v4592_v37 = vrot.slane %v4578_v34, %v7451_v40  ;;  %v8621_v19 = vrot.slane %v4593_v56, %v7451_v40 }
 0x383   : > { %v4657_v6 = vrot.slane %v6842_v31, %v7449_v33  ;;  %v7188_v32 = vpack.i.bf16 %v4712_v1, %v4647_v9  ;;  %v8624_v58 = vrot.slane %v4625_v46, %v7451_v40  ;;  %v4577_v54 = vcombine.low %v4521_v61, %v4537_v24  ;;  %v9290_v46 = vld [vmem:[#allocation6_spill] sm:$0xff] }
 0x384   : > { %v4624_v10 = vrot.slane %v4610_v4, %v7451_v40  ;;  %v8628_v45 = vrot.slane %v4697_v29, %v7451_v40  ;;  %v4609_v52 = vcombine.low %v4553_v12, %v4569_v16  ;;  %v4648_v25 = vcombine.high %v4608_v62, %v4640_v49  ;;  %v9291_v4 = vld [vmem:[#allocation5_spill] sm:$0xff] }
 0x385   : > { %v4682_v38 = vcombine.high %v4657_v6, %v4673_v22  ;;  %7189 = vrot.lane.b32.xlu1 %v7188_v32, %s7316_s26  ;;  %v4645_v59 = vcombine.low %v8621_v19, %v8624_v58  ;;  %v4646_v48 = vcombine.high %v8621_v19, %v8624_v58  ;;  %v4681_v53 = vcombine.low %v4657_v6, %v4673_v22  ;;  %v9292_v32 = vld [vmem:[#allocation10_spill] sm:$0xff] }
 0x386   : > { %v4643_v35 = vcombine.low %v4592_v37, %v4624_v10  ;;  %v4715_v14 = vcombine.high %v8628_v45, %v9251_v0  ;;  %v8639_v23 = vrot.slane %v4577_v54, %v7451_v40  ;;  %v8642_v42 = vrot.slane %v4609_v52, %v7451_v40  ;;  %v9295_v54 = vld [vmem:[#allocation3_spill] sm:$0xff] }
 0x387   : > { %v4696_v41 = vrot.slane %v4682_v38, %v7451_v40  ;;  %v8645_v8 = vrot.slane %v4681_v53, %v7451_v40  ;;  %v4716_v27 = vcombine.high %v4712_v1, %v9251_v0  ;;  %v4644_v20 = vcombine.high %v4592_v37, %v4624_v10  ;;  %v9287_v1 = vld [vmem:[#allocation14_spill] sm:$0xff]  ;;  %v9293_v37 = vld [vmem:[#allocation16_spill] sm:$0xff] }
 0x388   : > { %v7193_v55 = vpack.i.bf16 %v4715_v14, %v4646_v48  ;;  %v4641_v43 = vcombine.low %v8639_v23, %v8642_v42  ;;  %v4642_v61 = vcombine.high %v8639_v23, %v8642_v42  ;;  %v3607_v49 = vcombine.low %v8054_v39, %v8186_v50 }
 0x389   : > { %v7198_v15 = vpack.i.bf16 %v4696_v41, %v4643_v35  ;;  %v4714_v2 = vcombine.high %v4696_v41, %v9251_v0  ;;  %v4713_v24 = vcombine.high %v8645_v8, %v9251_v0  ;;  %v7203_v12 = vpack.i.bf16 %v4716_v27, %v4648_v25 }
 0x38a   : > { %7194 = vrot.lane.b32.xlu1 %v7193_v55, %s7317_s27  ;;  %v3907_v16 = vcombine.low %v9287_v1, %v8277_v28  ;;  %v3909_v9 = vcombine.low %v9288_v57, %v8280_v13  ;;  %v9289_v34 = vcombine.high %v8413_v30, %v8416_v21  ;;  %v6847_v6 = vcombine.low %v9291_v4, %v9290_v46 }
 0x38b   : > { %7199 = vrot.lane.b32.xlu0 %v7198_v15, %s7316_s26  ;;  %v7213_v62 = vpack.i.bf16 %v4714_v2, %v4644_v20  ;;  %v7208_v31 = vpack.i.bf16 %v4713_v24, %v4642_v61  ;;  %v6849_v22 = vcombine.high %v9291_v4, %v3607_v49  ;;  %v9294_v10 = vcombine.low %v9292_v32, %v9293_v37 }
 0x38c   : > { %v4206_v56 = vrot.slane %v9289_v34, %v7451_v40  ;;  %v6851_v29 = vcombine.high %v8186_v50, %v3907_v16  ;;  %v3308_v13 = vcombine.high %v9295_v54, %v9291_v4  ;;  %v4732_v48 = vrot.slane %v6847_v6, %v7449_v33 }
 0x38d   : > { %v6853_v38 = vcombine.high %v9294_v10, %v8277_v28  ;;  %v6855_v30 = vcombine.high %v3909_v9, %v8437_v36  ;;  %v3608_v52 = vcombine.high %v8054_v39, %v8186_v50  ;;  %v4748_v53 = vrot.slane %v6849_v22, %v7449_v33  ;;  %v9296_v50 = vld [vmem:[#allocation32_spill] sm:$0xff] }
 0x38e   : > { %v6857_v21 = vcombine.low %v8437_v36, %v4206_v56  ;;  %7204 = vrot.lane.b32.xlu1 %v7203_v12, %s7313_s18  ;;  %v4764_v35 = vrot.slane %v6851_v29, %v7449_v33  ;;  %v3908_v27 = vcombine.high %v9287_v1, %v8277_v28  ;;  %v9297_v15 = vcombine.low %v8407_v63, %v9296_v50  ;;  %v9299_v12 = vld [vmem:[#allocation4_spill] sm:$0xff] }
 0x38f   : > { %7209 = vrot.lane.b32.xlu0 %v7208_v31, %s7317_s27  ;;  %v4780_v41 = vrot.slane %v6853_v38, %v7449_v33  ;;  %v4868_v14 = vrot.slane %v6855_v30, %v7449_v33  ;;  %v4798_v20 = vcombine.high %v4732_v48, %v4748_v53  ;;  %v9298_v61 = vcombine.high %v8407_v63, %v9296_v50 }
 0x390   : > { %v4884_v25 = vrot.slane %v6857_v21, %v7449_v33  ;;  %v4183_v55 = vrot.slane %v9297_v15, %v7451_v40  ;;  %v6846_v49 = vcombine.low %v9295_v54, %v9299_v12  ;;  %v6848_v28 = vcombine.low %v3308_v13, %v8054_v39 }
 0x391   : > { %v4830_v2 = vcombine.high %v4764_v35, %v4780_v41  ;;  %v4190_v24 = vrot.slane %v9298_v61, %v7451_v40  ;;  %v6850_v9 = vcombine.low %v3608_v52, %v9287_v1  ;;  %v4812_v34 = vrot.slane %v4798_v20, %v7451_v40 }
 0x392   : > { %v4902_v16 = vcombine.high %v4868_v14, %v4884_v25  ;;  %v4208_v31 = vcombine.high %v4183_v55, %v8437_v36  ;;  %v4725_v46 = vrot.slane %v6846_v49, %v7449_v33  ;;  %v6852_v63 = vcombine.low %v9292_v32, %v3908_v27 }
 0x393   : > { %7214 = vrot.lane.b32.xlu0 %v7213_v62, %s7313_s18  ;;  %v4844_v56 = vrot.slane %v4830_v2, %v7451_v40  ;;  %v4741_v6 = vrot.slane %v6848_v28, %v7449_v33  ;;  %v4757_v36 = vrot.slane %v6850_v9, %v7449_v33  ;;  %v6856_v62 = vcombine.low %v4183_v55, %v4190_v24 }
 0x394   : > { %v4916_v4 = vrot.slane %v4902_v16, %v7451_v40  ;;  %v6854_v39 = vcombine.low %v9288_v57, %v4208_v31  ;;  %v4773_v1 = vrot.slane %v6852_v63, %v7449_v33  ;;  %v4797_v29 = vcombine.low %v4732_v48, %v4748_v53 }
 0x395   : > { %v4851_v22 = vcombine.low %v4812_v34, %v4844_v56  ;;  %v4782_v37 = vcombine.high %v4725_v46, %v4741_v6  ;;  %v4829_v38 = vcombine.low %v4764_v35, %v4780_v41  ;;  %v4901_v54 = vcombine.low %v4868_v14, %v4884_v25 }
 0x396   : > { %v4861_v10 = vrot.slane %v6854_v39, %v7449_v33  ;;  %v4814_v32 = vcombine.high %v4757_v36, %v4773_v1  ;;  %v4877_v30 = vrot.slane %v6856_v62, %v7449_v33  ;;  %v8717_v21 = vrot.slane %v4797_v29, %v7451_v40  ;;  %v9300_v39 = vld [vmem:[#allocation19_spill] sm:$0xff]  ;;  %v9304_v29 = vld [vmem:[#allocation22_spill] sm:$0xff] }
 0x397   : > { %v7218_v13 = vpack.i.bf16 %v4916_v4, %v4851_v22  ;;  %v4796_v52 = vrot.slane %v4782_v37, %v7451_v40  ;;  %v8721_v57 = vrot.slane %v4829_v38, %v7451_v40  ;;  %v8724_v27 = vrot.slane %v4901_v54, %v7451_v40  ;;  %v9303_v22 = vld [vmem:[#allocation26_spill] sm:$0xff]  ;;  %v9305_v37 = vld [vmem:[#allocation27_spill] sm:$0xff] }
 0x398   : > { %v4781_v48 = vcombine.low %v4725_v46, %v4741_v6  ;;  %v4828_v53 = vrot.slane %v4814_v32, %v7451_v40  ;;  %v4886_v35 = vcombine.high %v4861_v10, %v4877_v30  ;;  %v4813_v41 = vcombine.low %v4757_v36, %v4773_v1  ;;  %v9308_v32 = vld [vmem:[#allocation30_spill] sm:$0xff] }
 0x399   : > { %7219 = vrot.lane.b32.xlu1 %v7218_v13, %s7316_s26  ;;  %v4885_v14 = vcombine.low %v4861_v10, %v4877_v30  ;;  %v4849_v25 = vcombine.low %v8717_v21, %v8721_v57  ;;  %v4850_v50 = vcombine.high %v8717_v21, %v8721_v57  ;;  %v4919_v15 = vcombine.high %v8724_v27, %v9251_v0  ;;  %v9307_v13 = vld [vmem:[#allocation31_spill] sm:$0xff] }
 0x39a   : > { %v8735_v55 = vrot.slane %v4781_v48, %v7451_v40  ;;  %v4847_v20 = vcombine.low %v4796_v52, %v4828_v53  ;;  %v4900_v2 = vrot.slane %v4886_v35, %v7451_v40  ;;  %v8739_v61 = vrot.slane %v4813_v41, %v7451_v40  ;;  %v9309_v35 = vld [vmem:[#allocation18_spill] sm:$0xff]  ;;  %v9310_v41 = vld [vmem:[#allocation20_spill] sm:$0xff] }
 0x39b   : > { %v8742_v24 = vrot.slane %v4885_v14, %v7451_v40  ;;  %v7223_v12 = vpack.i.bf16 %v4919_v15, %v4850_v50  ;;  %v4852_v49 = vcombine.high %v4812_v34, %v4844_v56  ;;  %v4920_v16 = vcombine.high %v4916_v4, %v9251_v0  ;;  %v9301_v34 = vld [vmem:[#allocation17_spill] sm:$0xff] }
 0x39c   : > { %v4848_v31 = vcombine.high %v4796_v52, %v4828_v53  ;;  %v7228_v28 = vpack.i.bf16 %v4900_v2, %v4847_v20  ;;  %v4845_v9 = vcombine.low %v8735_v55, %v8739_v61  ;;  %v4846_v46 = vcombine.high %v8735_v55, %v8739_v61  ;;  %v9302_v4 = vld [vmem:[#allocation21_spill] sm:$0xff] }
 0x39d   : > { %v4917_v63 = vcombine.high %v8742_v24, %v9251_v0  ;;  %7224 = vrot.lane.b32.xlu1 %v7223_v12, %s7317_s27  ;;  %v7233_v6 = vpack.i.bf16 %v4920_v16, %v4852_v49  ;;  %v4918_v36 = vcombine.high %v4900_v2, %v9251_v0  ;;  %v3674_v56 = vcombine.low %v9301_v34, %v9300_v39 }
 0x39e   : > { %v3974_v1 = vcombine.low %v9303_v22, %v9302_v4  ;;  %7229 = vrot.lane.b32.xlu0 %v7228_v28, %s7316_s26  ;;  %v3976_v10 = vcombine.low %v9305_v37, %v9304_v29  ;;  %v9306_v38 = vcombine.high %v8449_v3, %v8452_v7  ;;  %v6859_v30 = vcombine.low %v9308_v32, %v9307_v13  ;;  %v9312_v7 = vld [vmem:[#allocation28_spill] sm:$0xff] }
 0x39f   : > { %v7238_v62 = vpack.i.bf16 %v4917_v63, %v4846_v46  ;;  %v7243_v52 = vpack.i.bf16 %v4918_v36, %v4848_v31  ;;  %v6861_v48 = vcombine.high %v9308_v32, %v3674_v56  ;;  %v9311_v14 = vcombine.low %v9309_v35, %v9310_v41  ;;  %v9314_v36 = vld [vmem:[#allocation34_spill] sm:$0xff] }
 0x3a0   : > { %v4273_v54 = vrot.slane %v9306_v38, %v7451_v40  ;;  %v6863_v53 = vcombine.high %v9300_v39, %v3974_v1  ;;  %v4936_v15 = vrot.slane %v6859_v30, %v7449_v33  ;;  %v6867_v20 = vcombine.high %v3976_v10, %v8472_v18 }
 0x3a1   : > { %v6865_v50 = vcombine.high %v9311_v14, %v9302_v4  ;;  %v3375_v2 = vcombine.high %v9312_v7, %v9308_v32  ;;  %7234 = vrot.lane.b32.xlu1 %v7233_v6, %s7313_s18  ;;  %v4952_v12 = vrot.slane %v6861_v48, %v7449_v33  ;;  %v3675_v31 = vcombine.high %v9301_v34, %v9300_v39  ;;  %v9313_v6 = vld [vmem:[#allocation33_spill] sm:$0xff] }
 0x3a2   : > { %v6869_v3 = vcombine.low %v8472_v18, %v4273_v54  ;;  %v4968_v49 = vrot.slane %v6863_v53, %v7449_v33  ;;  %7239 = vrot.lane.b32.xlu0 %v7238_v62, %s7317_s27  ;;  %v5072_v28 = vrot.slane %v6867_v20, %v7449_v33  ;;  %v3975_v63 = vcombine.high %v9303_v22, %v9302_v4  ;;  %v9317_v62 = vld [vmem:[#allocation29_spill] sm:$0xff] }
 0x3a3   : > { %v4984_v16 = vrot.slane %v6865_v50, %v7449_v33  ;;  %v9315_v56 = vcombine.low %v9313_v6, %v9314_v36  ;;  %v5002_v29 = vcombine.high %v4936_v15, %v4952_v12  ;;  %v9316_v39 = vcombine.high %v9313_v6, %v9314_v36 }
 0x3a4   : > { %v5088_v46 = vrot.slane %v6869_v3, %v7449_v33  ;;  %v6858_v54 = vcombine.low %v9312_v7, %v9317_v62  ;;  %v6860_v4 = vcombine.low %v3375_v2, %v9301_v34  ;;  %v6862_v30 = vcombine.low %v3675_v31, %v9303_v22 }
 0x3a5   : > { %v4250_v1 = vrot.slane %v9315_v56, %v7451_v40  ;;  %v5034_v10 = vcombine.high %v4968_v49, %v4984_v16  ;;  %v4257_v38 = vrot.slane %v9316_v39, %v7451_v40  ;;  %v5016_v48 = vrot.slane %v5002_v29, %v7451_v40 }
 0x3a6   : > { %v5106_v13 = vcombine.high %v5072_v28, %v5088_v46  ;;  %v4929_v41 = vrot.slane %v6858_v54, %v7449_v33  ;;  %v6864_v14 = vcombine.low %v9309_v35, %v3975_v63  ;;  %7244 = vrot.lane.b32.xlu0 %v7243_v52, %s7313_s18  ;;  %v4945_v20 = vrot.slane %v6860_v4, %v7449_v33 }
 0x3a7   : > { %v4275_v32 = vcombine.high %v4250_v1, %v8472_v18  ;;  %v5048_v53 = vrot.slane %v5034_v10, %v7451_v40  ;;  %v4961_v18 = vrot.slane %v6862_v30, %v7449_v33  ;;  %v6868_v7 = vcombine.low %v4250_v1, %v4257_v38 }
 0x3a8   : > { %v5120_v50 = vrot.slane %v5106_v13, %v7451_v40  ;;  %v4977_v22 = vrot.slane %v6864_v14, %v7449_v33  ;;  %v5001_v2 = vcombine.low %v4936_v15, %v4952_v12  ;;  %v4986_v31 = vcombine.high %v4929_v41, %v4945_v20 }
 0x3a9   : > { %v6866_v34 = vcombine.low %v9305_v37, %v4275_v32  ;;  %v5055_v3 = vcombine.low %v5016_v48, %v5048_v53  ;;  %v5033_v36 = vcombine.low %v4968_v49, %v4984_v16  ;;  %v5105_v35 = vcombine.low %v5072_v28, %v5088_v46 }
 0x3aa   : > { %v5018_v52 = vcombine.high %v4961_v18, %v4977_v22  ;;  %v5081_v56 = vrot.slane %v6868_v7, %v7449_v33  ;;  %v8814_v29 = vrot.slane %v5001_v2, %v7451_v40  ;;  %v5000_v10 = vrot.slane %v4986_v31, %v7451_v40  ;;  %v9318_v31 = vld [vmem:[#allocation8_spill] sm:$0xff] }
 0x3ab   : > { %v5065_v6 = vrot.slane %v6866_v34, %v7449_v33  ;;  %v7248_v63 = vpack.i.bf16 %v5120_v50, %v5055_v3  ;;  %v8818_v37 = vrot.slane %v5033_v36, %v7451_v40  ;;  %v8821_v1 = vrot.slane %v5105_v35, %v7451_v40  ;;  %v9322_v35 = vld [vmem:[#allocation23_spill] sm:$0xff] }
 0x3ac   : > { %v4985_v15 = vcombine.low %v4929_v41, %v4945_v20  ;;  %v5032_v12 = vrot.slane %v5018_v52, %v7451_v40  ;;  %v5017_v16 = vcombine.low %v4961_v18, %v4977_v22  ;;  %v5056_v41 = vcombine.high %v5016_v48, %v5048_v53  ;;  %v9319_v48 = vld [vmem:[#allocation7_spill] sm:$0xff] }
 0x3ad   : > { %7249 = vrot.lane.b32.xlu1 %v7248_v63, %s7316_s26  ;;  %v5090_v49 = vcombine.high %v5065_v6, %v5081_v56  ;;  %v5089_v28 = vcombine.low %v5065_v6, %v5081_v56  ;;  %v5053_v46 = vcombine.low %v8814_v29, %v8818_v37  ;;  %v5054_v39 = vcombine.high %v8814_v29, %v8818_v37  ;;  %v9321_v6 = vld [vmem:[#allocation9_spill] sm:$0xff] }
 0x3ae   : > { %v5123_v38 = vcombine.high %v8821_v1, %v9251_v0  ;;  %v8832_v62 = vrot.slane %v4985_v15, %v7451_v40  ;;  %v5051_v54 = vcombine.low %v5000_v10, %v5032_v12  ;;  %v8836_v32 = vrot.slane %v5017_v16, %v7451_v40  ;;  %v9323_v63 = vld [vmem:[#allocation13_spill] sm:$0xff] }
 0x3af   : > { %v5104_v13 = vrot.slane %v5090_v49, %v7451_v40  ;;  %v8839_v4 = vrot.slane %v5089_v28, %v7451_v40  ;;  %v5124_v14 = vcombine.high %v5120_v50, %v9251_v0  ;;  %v5052_v20 = vcombine.high %v5000_v10, %v5032_v12  ;;  %v9320_v50 = vld [vmem:[#allocation11_spill] sm:$0xff]  ;;  %v9324_v56 = vld [vmem:[#allocation25_spill] sm:$0xff]  ;;  %v9325_v10 = vld [vmem:[#allocation12_spill] sm:$0xff] }
 0x3b0   : > { %v7253_v30 = vpack.i.bf16 %v5123_v38, %v5054_v39  ;;  %v5049_v34 = vcombine.low %v8832_v62, %v8836_v32  ;;  %v5050_v3 = vcombine.high %v8832_v62, %v8836_v32  ;;  %v5125_v53 = vcombine.low %v9319_v48, %v9318_v31  ;;  %v9326_v12 = vld [vmem:[#allocation37_spill] sm:$0xff]  ;;  %v9327_v49 = vld [vmem:[#allocation24_spill] sm:$0xff] }
 0x3b1   : > { %v7258_v18 = vpack.i.bf16 %v5104_v13, %v5051_v54  ;;  %v5121_v22 = vcombine.high %v8839_v4, %v9251_v0  ;;  %v7263_v7 = vpack.i.bf16 %v5124_v14, %v5056_v41  ;;  %v5122_v2 = vcombine.high %v5104_v13, %v9251_v0  ;;  %v9328_v54 = vld [vmem:[#allocation36_spill] sm:$0xff]  ;;  %v9329_v13 = vld [vmem:[#allocation35_spill] sm:$0xff] }
 0x3b2   : > { %7254 = vrot.lane.b32.xlu1 %v7253_v30, %s7317_s27  ;;  %v5133_v36 = vcombine.low %v9321_v6, %v9320_v50  ;;  %v5141_v52 = vcombine.low %v9323_v63, %v9322_v35  ;;  %v5149_v15 = vcombine.low %v9325_v10, %v9324_v56  ;;  %v5175_v16 = vcombine.low %v9327_v49, %v9326_v12  ;;  %v5767_v35 = vld [vmem:[%s9208_s4] sm:$0xff] }
 0x3b3   : > { %7259 = vrot.lane.b32.xlu0 %v7258_v18, %s7316_s26  ;;  %v7273_v28 = vpack.i.bf16 %v5122_v2, %v5052_v20  ;;  %v5132_v39 = vrot.slane %v5125_v53, %v7449_v33  ;;  %v5183_v30 = vcombine.low %v9329_v13, %v9328_v54  ;;  %v7268_v41 = vpack.i.bf16 %v5121_v22, %v5050_v3 }
 0x3b4   : > { %v5140_v38 = vrot.slane %v5133_v36, %v7449_v33  ;;  %v5148_v14 = vrot.slane %v5141_v52, %v7449_v33  ;;  %v5156_v18 = vrot.slane %v5149_v15, %v7449_v33  ;;  %v5182_v31 = vrot.slane %v5175_v16, %v7449_v33 }
 0x3b5   : > { %v5190_v50 = vrot.slane %v5183_v30, %v7449_v33 }
 0x3b6   : > { %7264 = vrot.lane.b32.xlu1 %v7263_v7, %s7313_s18  ;;  %v5157_v48 = vcombine.low %v5132_v39, %v5140_v38  ;;  %v5165_v20 = vcombine.low %v5148_v14, %v5156_v18 }
 0x3b7   : > { %7269 = vrot.lane.b32.xlu0 %v7268_v41, %s7317_s27  ;;  %v5191_v2 = vcombine.low %v5182_v31, %v5190_v50 }
 0x3b8   : > { %v8872_v53 = vrot.slane %v5157_v48, %v7451_v40  ;;  %v8875_v3 = vrot.slane %v5165_v20, %v7451_v40 }
 0x3b9   : > { %v8878_v22 = vrot.slane %v5191_v2, %v7451_v40  ;;  %v7318_v40 = vmov 0  }
 0x3ba   : > { %v5173_v7 = vcombine.low %v8872_v53, %v8875_v3  ;;  %v5174_v33 = vcombine.high %v8872_v53, %v8875_v3  ;;  %7283 = vset.pattern.permute.xlu0 %v7318_v40  ;;  %v8928_v40 = vld [vmem:[%s9207_s3] sm:$0xff]  ;;  %v6897_v53 = vld [vmem:[%s9207_s3 + $0x10] sm:$0xff]  ;;  %v9332_v3 = vmov 0.0|0.0  }
 0x3bb   : > { %7274 = vrot.lane.b32.xlu0 %v7273_v28, %s7313_s18  ;;  %v5199_v6 = vcombine.high %v8878_v22, %v9251_v0 }
 0x3bd   : > { %v7278_v36 = vpack.i.bf16 %v5199_v6, %v5174_v33 }
 0x3bf   : > { %7279 = vrot.lane.b32.xlu1 %v7278_v36, %s7317_s27  ;;  %5770 = vperm.xlu0 %7283, %v5767_v35  }
 0x3e2   : > { %v7160_v63 = vpop.permute.xlu1 %7159 }
 0x3e3   : > { %v7162_v16 = vunpack.i.h.bf16 %v7160_v63  ;;  %v7161_v28 = vunpack.i.l.bf16 %v7160_v63 }
 0x3e7   : > { %v7165_v52 = vpop.permute.xlu1 %7164 }
 0x3e8   : > { %v7167_v10 = vunpack.i.h.bf16 %v7165_v52  ;;  %v7166_v15 = vunpack.i.l.bf16 %v7165_v52 }
 0x3ea   : > { %v7170_v56 = vpop.permute.xlu0 %7169  ;;  %v5410_v12 = vsel %vm5400_vm2, %v8531_v26, %v7167_v10  ;;  %v5409_v49 = vsel %vm5400_vm2, %v4441_v5, %v7166_v15 }
 0x3eb   : > { %v7175_v39 = vpop.permute.xlu1 %7174  ;;  %v5411_v14 = vsel %vm5403_vm3, %v5409_v49, %v7161_v28  ;;  %v5412_v26 = vsel %vm5403_vm3, %v5410_v12, %v7162_v16  ;;  %v7172_v50 = vunpack.i.h.bf16 %v7170_v56  ;;  %v7171_v20 = vunpack.i.l.bf16 %v7170_v56 }
 0x3ec   : > { %v7177_v54 = vunpack.i.h.bf16 %v7175_v39  ;;  %v7176_v13 = vunpack.i.l.bf16 %v7175_v39 }
 0x3ee   : > { %v7180_v38 = vpop.permute.xlu0 %7179  ;;  %v5413_v18 = vsel %vm5406_vm4, %v5411_v14, %v7176_v13  ;;  %v5414_v60 = vsel %vm5406_vm4, %v5412_v26, %v7177_v54 }
 0x3ef   : > { %v7182_v30 = vunpack.i.h.bf16 %v7180_v38  ;;  %v7181_v41 = vunpack.i.l.bf16 %v7180_v38  ;;  %v8911_v48 = vpack.c.bf16 %v5414_v60, %v5413_v18 }
 0x3f1   : > { %v5402_v5 = vsel %vm5400_vm2, %v8553_v51, %v7182_v30  ;;  %v5401_v31 = vsel %vm5400_vm2, %v4437_v11, %v7181_v41  ;;  %7044 = vmatprep.subr.msk.bf16.mxu0 %vm8901_vm7, %v8911_v48 }
 0x3f2   : > { %v7185_v2 = vpop.permute.xlu0 %7184  ;;  %v5404_v36 = vsel %vm5403_vm3, %v5401_v31, %v7171_v20  ;;  %v5405_v51 = vsel %vm5403_vm3, %v5402_v5, %v7172_v50 }
 0x3f3   : > { %v7187_v33 = vunpack.i.h.bf16 %v7185_v2  ;;  %v7186_v6 = vunpack.i.l.bf16 %v7185_v2 }
 0x3f5   : > { %v5407_v35 = vsel %vm5406_vm4, %v5404_v36, %v7186_v6  ;;  %v5408_v47 = vsel %vm5406_vm4, %v5405_v51, %v7187_v33 }
 0x3f6   : > { %v8920_v44 = vpack.c.bf16 %v5408_v47, %v5407_v35 }
 0x3f7   : > { %v7190_v11 = vpop.permute.xlu1 %7189 }
 0x3f8   : > { %7047 = vmatpush1.bf16.msk.msra.mxu0 %vm8901_vm7, %v8920_v44  ;;  %v7192_v49 = vunpack.i.h.bf16 %v7190_v11  ;;  %v7191_v16 = vunpack.i.l.bf16 %v7190_v11 }
 0x3fb   : > { %6872 = vmatmul.mubr.msk.f32.vlgmr.msra.gmra.mrb[10].mxu0 %vm5454_vm8, %v8928_v40 }
 0x3fc   : > { %v7195_v52 = vpop.permute.xlu1 %7194  ;;  %5618 = vmatprep.mubr.f32.mxu0 %v9251_v0 }
 0x3fd   : > { %v7200_v63 = vpop.permute.xlu0 %7199  ;;  %v7197_v56 = vunpack.i.h.bf16 %v7195_v52  ;;  %v7196_v10 = vunpack.i.l.bf16 %v7195_v52 }
 0x3fe   : > { %v7202_v26 = vunpack.i.h.bf16 %v7200_v63  ;;  %v7201_v18 = vunpack.i.l.bf16 %v7200_v63 }
 0x3ff   : > { %v5422_v15 = vsel %vm5400_vm2, %v8628_v45, %v7197_v56  ;;  %v5421_v12 = vsel %vm5400_vm2, %v4645_v59, %v7196_v10 }
 0x400   : > { %v7205_v39 = vpop.permute.xlu1 %7204  ;;  %v5423_v41 = vsel %vm5403_vm3, %v5421_v12, %v7191_v16  ;;  %v5424_v14 = vsel %vm5403_vm3, %v5422_v15, %v7192_v49 }
 0x401   : > { %v7210_v28 = vpop.permute.xlu0 %7209  ;;  %v7207_v13 = vunpack.i.h.bf16 %v7205_v39  ;;  %v7206_v30 = vunpack.i.l.bf16 %v7205_v39 }
 0x402   : > { %v7212_v38 = vunpack.i.h.bf16 %v7210_v28  ;;  %v7211_v54 = vunpack.i.l.bf16 %v7210_v28 }
 0x403   : > { %v5425_v58 = vsel %vm5406_vm4, %v5423_v41, %v7206_v30  ;;  %v5426_v59 = vsel %vm5406_vm4, %v5424_v14, %v7207_v13 }
 0x404   : > { %v5416_v45 = vsel %vm5400_vm2, %v8645_v8, %v7212_v38  ;;  %v5415_v19 = vsel %vm5400_vm2, %v4641_v43, %v7211_v54  ;;  %v8949_v60 = vpack.c.bf16 %v5426_v59, %v5425_v58 }
 0x405   : > { %v7215_v5 = vpop.permute.xlu0 %7214  ;;  %v5417_v20 = vsel %vm5403_vm3, %v5415_v19, %v7201_v18  ;;  %v5418_v8 = vsel %vm5403_vm3, %v5416_v45, %v7202_v26 }
 0x406   : > { %v7217_v31 = vunpack.i.h.bf16 %v7215_v5  ;;  %v7216_v50 = vunpack.i.l.bf16 %v7215_v5  ;;  %7050 = vmatprep.subr.msk.bf16.mxu0 %vm8901_vm7, %v8949_v60 }
 0x408   : > { %v5419_v23 = vsel %vm5406_vm4, %v5417_v20, %v7216_v50  ;;  %v5420_v42 = vsel %vm5406_vm4, %v5418_v8, %v7217_v31 }
 0x409   : > { %v8958_v43 = vpack.c.bf16 %v5420_v42, %v5419_v23 }
 0x40b   : > { %v7220_v2 = vpop.permute.xlu1 %7219  ;;  %7053 = vmatpush1.bf16.msk.msra.mxu0 %vm8901_vm7, %v8958_v43 }
 0x40c   : > { %v7222_v11 = vunpack.i.h.bf16 %v7220_v2  ;;  %v7221_v63 = vunpack.i.l.bf16 %v7220_v2 }
 0x40e   : > { %6875 = vmatmul.mubr.msk.f32.vlgmr.msra.gmra.mrb[12].mxu0 %vm5454_vm8, %v8928_v40 }
 0x40f   : > { %5689 = vmatprep.mubr.f32.mxu0 %v9251_v0  ;;  %v7225_v33 = vpop.permute.xlu1 %7224 }
 0x410   : > { %v7230_v6 = vpop.permute.xlu0 %7229  ;;  %v7227_v36 = vunpack.i.h.bf16 %v7225_v33  ;;  %v7226_v51 = vunpack.i.l.bf16 %v7225_v33 }
 0x411   : > { %v7232_v38 = vunpack.i.h.bf16 %v7230_v6  ;;  %v7231_v54 = vunpack.i.l.bf16 %v7230_v6 }
 0x412   : > { %v5434_v35 = vsel %vm5400_vm2, %v8724_v27, %v7227_v36  ;;  %v5433_v47 = vsel %vm5400_vm2, %v4849_v25, %v7226_v51 }
 0x413   : > { %v7235_v52 = vpop.permute.xlu1 %7234  ;;  %v5435_v16 = vsel %vm5403_vm3, %v5433_v47, %v7221_v63  ;;  %v5436_v28 = vsel %vm5403_vm3, %v5434_v35, %v7222_v11 }
 0x414   : > { %v7240_v56 = vpop.permute.xlu0 %7239  ;;  %v7237_v10 = vunpack.i.h.bf16 %v7235_v52  ;;  %v7236_v15 = vunpack.i.l.bf16 %v7235_v52 }
 0x415   : > { %v7242_v12 = vunpack.i.h.bf16 %v7240_v56  ;;  %v7241_v49 = vunpack.i.l.bf16 %v7240_v56 }
 0x416   : > { %v5437_v39 = vsel %vm5406_vm4, %v5435_v16, %v7236_v15  ;;  %v5438_v27 = vsel %vm5406_vm4, %v5436_v28, %v7237_v10 }
 0x417   : > { %v5428_v21 = vsel %vm5400_vm2, %v8742_v24, %v7242_v12  ;;  %v5427_v57 = vsel %vm5400_vm2, %v4845_v9, %v7241_v49  ;;  %v8982_v25 = vpack.c.bf16 %v5438_v27, %v5437_v39  ;;  %v6882_v39 = vld [vmem:[%s9207_s3 + $0x8] sm:$0xff] }
 0x418   : > { %v7245_v13 = vpop.permute.xlu0 %7244  ;;  %v5429_v14 = vsel %vm5403_vm3, %v5427_v57, %v7231_v54  ;;  %v5430_v24 = vsel %vm5403_vm3, %v5428_v21, %v7232_v38 }
 0x419   : > { %v7247_v30 = vunpack.i.h.bf16 %v7245_v13  ;;  %v7246_v41 = vunpack.i.l.bf16 %v7245_v13  ;;  %7056 = vmatprep.subr.msk.bf16.mxu0 %vm8901_vm7, %v8982_v25 }
 0x41b   : > { %v5431_v45 = vsel %vm5406_vm4, %v5429_v14, %v7246_v41  ;;  %v5432_v55 = vsel %vm5406_vm4, %v5430_v24, %v7247_v30 }
 0x41c   : > { %v8991_v61 = vpack.c.bf16 %v5432_v55, %v5431_v45 }
 0x41e   : > { %7059 = vmatpush1.bf16.msk.msra.mxu0 %vm8901_vm7, %v8991_v61 }
 0x41f   : > { %v7250_v9 = vpop.permute.xlu1 %7249 }
 0x420   : > { %v7252_v31 = vunpack.i.h.bf16 %v7250_v9  ;;  %v7251_v50 = vunpack.i.l.bf16 %v7250_v9 }
 0x421   : > { %6878 = vmatmul.mubr.msk.f32.vlgmr.msra.gmra.mrb[14].mxu0 %vm5454_vm8, %v8928_v40 }
 0x422   : > { %5760 = vmatprep.mubr.f32.mxu0 %v9251_v0 }
 0x424   : > { %v7255_v19 = vpop.permute.xlu1 %7254 }
 0x425   : > { %v7260_v58 = vpop.permute.xlu0 %7259  ;;  %v7257_v59 = vunpack.i.h.bf16 %v7255_v19  ;;  %v7256_v26 = vunpack.i.l.bf16 %v7255_v19 }
 0x426   : > { %v7262_v35 = vunpack.i.h.bf16 %v7260_v58  ;;  %v7261_v47 = vunpack.i.l.bf16 %v7260_v58 }
 0x427   : > { %v5446_v18 = vsel %vm5400_vm2, %v8821_v1, %v7257_v59  ;;  %v5445_v5 = vsel %vm5400_vm2, %v5053_v46, %v7256_v26 }
 0x428   : > { %v7265_v20 = vpop.permute.xlu1 %7264  ;;  %v5447_v6 = vsel %vm5403_vm3, %v5445_v5, %v7251_v50  ;;  %v5448_v36 = vsel %vm5403_vm3, %v5446_v18, %v7252_v31 }
 0x429   : > { %v7270_v8 = vpop.permute.xlu0 %7269  ;;  %v7267_v23 = vunpack.i.h.bf16 %v7265_v20  ;;  %v7266_v42 = vunpack.i.l.bf16 %v7265_v20 }
 0x42a   : > { %v7272_v2 = vunpack.i.h.bf16 %v7270_v8  ;;  %v7271_v33 = vunpack.i.l.bf16 %v7270_v8 }
 0x42b   : > { %v5449_v51 = vsel %vm5406_vm4, %v5447_v6, %v7266_v42  ;;  %v5450_v1 = vsel %vm5406_vm4, %v5448_v36, %v7267_v23 }
 0x42c   : > { %v5440_v29 = vsel %vm5400_vm2, %v8839_v4, %v7272_v2  ;;  %v5439_v37 = vsel %vm5400_vm2, %v5049_v34, %v7271_v33  ;;  %v7060_v46 = vpack.c.bf16 %v5450_v1, %v5449_v51 }
 0x42d   : > { %v7275_v11 = vpop.permute.xlu0 %7274  ;;  %v5441_v56 = vsel %vm5403_vm3, %v5439_v37, %v7261_v47  ;;  %v5442_v10 = vsel %vm5403_vm3, %v5440_v29, %v7262_v35  ;;  %v9147_v47 = vstv %s6604_s12 }
 0x42e   : > { %v7277_v63 = vunpack.i.h.bf16 %v7275_v11  ;;  %v7276_v52 = vunpack.i.l.bf16 %v7275_v11  ;;  %7062 = vmatprep.subr.msk.bf16.mxu0 %vm8901_vm7, %v7060_v46 }
 0x430   : > { %v5443_v4 = vsel %vm5406_vm4, %v5441_v56, %v7276_v52  ;;  %v5444_v15 = vsel %vm5406_vm4, %v5442_v10, %v7277_v63 }
 0x431   : > { %v7063_v62 = vpack.c.bf16 %v5444_v15, %v5443_v4  ;;  %v7280_v32 = vpop.permute.xlu1 %7279 }
 0x432   : > { %v7282_v34 = vunpack.i.h.bf16 %v7280_v32  ;;  %v7281_v12 = vunpack.i.l.bf16 %v7280_v32 }
 0x433   : > { %7065 = vmatpush1.bf16.msk.msra.mxu0 %vm8901_vm7, %v7063_v62 }
 0x434   : > { %7068 = vmatprep.subr.msk.bf16.mxu0 %vm8901_vm7, %v8911_v48  ;;  %v5452_v49 = vsel %vm5400_vm2, %v8878_v22, %v7282_v34  ;;  %v5451_v16 = vsel %vm5400_vm2, %v5173_v7, %v7281_v12 }
 0x435   : > { %v7091_v28 = vpack.c.bf16 %v5452_v49, %v5451_v16 }
 0x436   : > { %6881 = vmatmul.mubr.msk.f32.vlgmr.msra.gmra.mrb[16].mxu0 %vm5454_vm8, %v8928_v40 }
 0x437   : > { %7071 = vmatpush1.bf16.msk.msra.mxu0 %vm8901_vm7, %v8920_v44  ;;  %5853 = vmatprep.mubr.f32.mxu0 %v9251_v0 }
 0x438   : > { %7121 = vmatpush3.bf16.msk.msra.mxu1 %vm8901_vm7, %v7091_v28  ;;  %7074 = vmatprep.subr.msk.bf16.mxu0 %vm8901_vm7, %v8949_v60 }
 0x43a   : > { %6885 = vmatmul.mubr.msk.f32.vlgmr.msra.gmra.mrb[18].mxu0 %vm5454_vm8, %v6882_v39 }
 0x43b   : > { %7077 = vmatpush1.bf16.msk.msra.mxu0 %vm8901_vm7, %v8958_v43  ;;  %5924 = vmatprep.mubr.f32.mxu0 %v9251_v0 }
 0x43c   : > { %7080 = vmatprep.subr.msk.bf16.mxu0 %vm8901_vm7, %v8982_v25  ;;  %7034 = vmatmul.mubr.msk.f32.vlgmr.msra.gmra.mrb[34].mxu1 %vm5454_vm8, %v6897_v53 }
 0x43e   : > { %6888 = vmatmul.mubr.msk.f32.vlgmr.msra.gmra.mrb[20].mxu0 %vm5454_vm8, %v6882_v39  ;;  %v9138_v18 = vpop.permute.xlu0 %5770 }
 0x43f   : > { %7083 = vmatpush1.bf16.msk.msra.mxu0 %vm8901_vm7, %v8991_v61  ;;  %5995 = vmatprep.mubr.f32.mxu0 %v9251_v0 }
 0x440   : > { %7086 = vmatprep.subr.msk.bf16.mxu0 %vm8901_vm7, %v7060_v46 }
 0x442   : > { %6891 = vmatmul.mubr.msk.f32.vlgmr.msra.gmra.mrb[22].mxu0 %vm5454_vm8, %v6882_v39 }
 0x443   : > { %7089 = vmatpush1.bf16.msk.msra.mxu0 %vm8901_vm7, %v7063_v62  ;;  %6066 = vmatprep.mubr.f32.mxu0 %v9251_v0 }
 0x444   : > { %7090 = vmatprep.subr.bf16.mxu0 %v9332_v3 }
 0x446   : > { %6894 = vmatmul.mubr.msk.f32.vlgmr.msra.gmra.mrb[24].mxu0 %vm5454_vm8, %v6882_v39 }
 0x447   : > { %7093 = vmatpush3.bf16.msk.msra.mxu0 %vm8901_vm7, %v7091_v28  ;;  %7026 = vmatprep.mubr.msk.f32.mxu0 %vm7309_vm0, %v9251_v0 }
 0x448   : > { %7096 = vmatprep.subr.msk.bf16.mxu0 %vm8901_vm7, %v8911_v48 }
 0x44a   : > { %7027 = vmatmul.mubr.msk.f32.vlgmr.msra.gmra.mrb[26].mxu0 %vm5454_vm8, %v6882_v39 }
 0x44b   : > { %7099 = vmatpush1.bf16.msk.msra.mxu0 %vm8901_vm7, %v8920_v44  ;;  %6263 = vmatprep.mubr.f32.mxu0 %v9251_v0 }
 0x44c   : > { %7102 = vmatprep.subr.msk.bf16.mxu0 %vm8901_vm7, %v8949_v60 }
 0x44e   : > { %6900 = vmatmul.mubr.msk.f32.vlgmr.msra.gmra.mrb[28].mxu0 %vm5454_vm8, %v6897_v53 }
 0x44f   : > { %7105 = vmatpush1.bf16.msk.msra.mxu0 %vm8901_vm7, %v8958_v43  ;;  %6334 = vmatprep.mubr.f32.mxu0 %v9251_v0 }
 0x450   : > { %7108 = vmatprep.subr.msk.bf16.mxu0 %vm8901_vm7, %v8982_v25 }
 0x452   : > { %6903 = vmatmul.mubr.msk.f32.vlgmr.msra.gmra.mrb[30].mxu0 %vm5454_vm8, %v6897_v53 }
 0x453   : > { %7111 = vmatpush1.bf16.msk.msra.mxu0 %vm8901_vm7, %v8991_v61  ;;  %6405 = vmatprep.mubr.f32.mxu0 %v9251_v0 }
 0x454   : > { %7114 = vmatprep.subr.msk.bf16.mxu0 %vm8901_vm7, %v7060_v46 }
 0x456   : > { %6906 = vmatmul.mubr.msk.f32.vlgmr.msra.gmra.mrb[32].mxu0 %vm5454_vm8, %v6897_v53 }
 0x457   : > { %7117 = vmatpush1.bf16.msk.msra.mxu0 %vm8901_vm7, %v7063_v62  ;;  %6476 = vmatprep.mubr.f32.mxu0 %v9251_v0 }
 0x45a   : > { %6909 = vmatmul.mubr.msk.f32.vlgmr.msra.gmra.mrb[34].mxu0 %vm5454_vm8, %v6897_v53 }
 0x4ce   : > { %v5549_v22 = vpop.f32.mrb[10].mxu0 }
 0x4cf   : > { %v9106_v7 = vpop.f32.mrb[11].mxu0  ;;  %v5773_v36 = vadd.f32 %v9138_v18, %v5549_v22 }
 0x4d0   : > { %v5774_v46 = vadd.f32 %v9138_v18, %v9106_v7 }
 0x4e1   : > { %v9108_v48 = vpop.f32.mrb[12].mxu0 }
 0x4e2   : > { %v9110_v44 = vpop.f32.mrb[13].mxu0  ;;  %v5775_v63 = vadd.f32 %v9138_v18, %v9108_v48 }
 0x4e3   : > { %v5776_v12 = vadd.f32 %v9138_v18, %v9110_v44 }
 0x4f4   : > { %v9112_v40 = vpop.f32.mrb[14].mxu0 }
 0x4f5   : > { %v9114_v60 = vpop.f32.mrb[15].mxu0  ;;  %v5777_v39 = vadd.f32 %v9138_v18, %v9112_v40 }
 0x4f6   : > { %v5778_v53 = vadd.f32 %v9138_v18, %v9114_v60 }
 0x509   : > { %v9116_v43 = vpop.f32.mrb[16].mxu0 }
 0x50a   : > { %v9118_v27 = vpop.f32.mrb[17].mxu0 }
 0x50d   : > { %v5855_v17 = vpop.f32.mrb[18].mxu0 }
 0x50e   : > { %6152 = vrot.lane.b32.xlu1 %v5855_v17, %s7313_s18  ;;  %v5857_v0 = vpop.f32.mrb[19].mxu0 }
 0x50f   : > { %v6549_v21 = vpop.f32.mrb[34].mxu1 }
 0x510   : > { %v7035_v57 = vpop.f32.mrb[35].mxu1 }
 0x511   : > { %v5926_v25 = vpop.f32.mrb[20].mxu0 }
 0x512   : > { %6154 = vrot.lane.b32.xlu1 %v5857_v0, %s7313_s18  ;;  %6156 = vrot.lane.b32.xlu0 %v5926_v25, %s7313_s18  ;;  %v5928_v38 = vpop.f32.mrb[21].mxu0 }
 0x515   : > { %v5997_v54 = vpop.f32.mrb[22].mxu0 }
 0x516   : > { %6158 = vrot.lane.b32.xlu1 %v5928_v38, %s7313_s18  ;;  %6160 = vrot.lane.b32.xlu0 %v5997_v54, %s7313_s18  ;;  %v5999_v13 = vpop.f32.mrb[23].mxu0 }
 0x519   : > { %v6068_v30 = vpop.f32.mrb[24].mxu0 }
 0x51a   : > { %6162 = vrot.lane.b32.xlu1 %v5999_v13, %s7313_s18  ;;  %6164 = vrot.lane.b32.xlu0 %v6068_v30, %s7313_s18  ;;  %v6070_v41 = vpop.f32.mrb[25].mxu0  ;;  %v5779_v13 = vadd.f32 %v9138_v18, %v9116_v43 }
 0x51d   : > { %v6139_v14 = vpop.f32.mrb[26].mxu0 }
 0x51e   : > { %6166 = vrot.lane.b32.xlu1 %v6070_v41, %s7313_s18  ;;  %6168 = vrot.lane.b32.xlu0 %v6139_v14, %s7313_s18  ;;  %v7028_v24 = vpop.f32.mrb[27].mxu0 }
 0x521   : > { %v6265_v45 = vpop.f32.mrb[28].mxu0 }
 0x522   : > { %6562 = vrot.lane.b32.xlu1 %v6265_v45, %s7316_s26  ;;  %v6267_v55 = vpop.f32.mrb[29].mxu0 }
 0x523   : > { %6564 = vrot.lane.b32.xlu0 %v6267_v55, %s7316_s26 }
 0x525   : > { %v6336_v61 = vpop.f32.mrb[30].mxu0 }
 0x526   : > { %6566 = vrot.lane.b32.xlu1 %v6336_v61, %s7316_s26  ;;  %v6338_v9 = vpop.f32.mrb[31].mxu0 }
 0x527   : > { %6568 = vrot.lane.b32.xlu0 %v6338_v9, %s7316_s26 }
 0x529   : > { %v6407_v19 = vpop.f32.mrb[32].mxu0 }
 0x52a   : > { %6570 = vrot.lane.b32.xlu1 %v6407_v19, %s7316_s26  ;;  %v6409_v58 = vpop.f32.mrb[33].mxu0 }
 0x52b   : > { %6572 = vrot.lane.b32.xlu0 %v6409_v58, %s7316_s26  ;;  %v5780_v58 = vadd.f32 %v9138_v18, %v9118_v27 }
 0x52d   : > { %v6478_v59 = vpop.f32.mrb[34].mxu0 }
 0x52e   : > { %6574 = vrot.lane.b32.xlu1 %v6478_v59, %s7316_s26  ;;  %v6480_v26 = vpop.f32.mrb[35].mxu0 }
 0x52f   : > { %6576 = vrot.lane.b32.xlu0 %v6480_v26, %s7316_s26 }
 0x532   : > { %6578 = vrot.lane.b32.xlu1 %v6549_v21, %s7316_s26 }
 0x580   : > { %v6153_v5 = vpop.permute.xlu1 %6152 }
 0x584   : > { %v6155_v31 = vpop.permute.xlu1 %6154  ;;  %v6157_v50 = vpop.permute.xlu0 %6156 }
 0x585   : > { %v6170_v6 = vsel %vm5406_vm4, %v6153_v5, %v6155_v31  ;;  %v6171_v29 = vsel %vm5406_vm4, %v6155_v31, %v6157_v50 }
 0x586   : > { %v6186_v1 = vadd.f32 %v6170_v6, %v5773_v36  ;;  %v6187_v56 = vadd.f32 %v6171_v29, %v5774_v46 }
 0x588   : > { %v6159_v20 = vpop.permute.xlu1 %6158  ;;  %v6161_v8 = vpop.permute.xlu0 %6160 }
 0x589   : > { %v6172_v35 = vsel %vm5406_vm4, %v6157_v50, %v6159_v20  ;;  %v6173_v10 = vsel %vm5406_vm4, %v6159_v20, %v6161_v8 }
 0x58a   : > { %v6188_v15 = vadd.f32 %v6172_v35, %v5775_v63  ;;  %v6189_v7 = vadd.f32 %v6173_v10, %v5776_v12 }
 0x58c   : > { %v6163_v23 = vpop.permute.xlu1 %6162  ;;  %v6165_v42 = vpop.permute.xlu0 %6164 }
 0x58d   : > { %v6174_v49 = vsel %vm5406_vm4, %v6161_v8, %v6163_v23  ;;  %v6175_v48 = vsel %vm5406_vm4, %v6163_v23, %v6165_v42 }
 0x58e   : > { %v6190_v0 = vadd.f32 %v6174_v49, %v5777_v39  ;;  %v6191_v14 = vadd.f32 %v6175_v48, %v5778_v53 }
 0x590   : > { %v6167_v2 = vpop.permute.xlu1 %6166  ;;  %v6169_v33 = vpop.permute.xlu0 %6168 }
 0x591   : > { %v6176_v60 = vsel %vm5406_vm4, %v6165_v42, %v6167_v2  ;;  %v6177_v24 = vsel %vm5406_vm4, %v6167_v2, %v6169_v33 }
 0x592   : > { %v6192_v61 = vadd.f32 %v6176_v60, %v5779_v13  ;;  %v6193_v20 = vadd.f32 %v6177_v24, %v5780_v58 }
 0x594   : > { %v6563_v51 = vpop.permute.xlu1 %6562 }
 0x595   : > { %v6565_v37 = vpop.permute.xlu0 %6564 }
 0x596   : > { %v6580_v11 = vsel %vm5403_vm3, %v6563_v51, %v6565_v37 }
 0x597   : > { %v6596_v52 = vadd.f32 %v6580_v11, %v6186_v1 }
 0x598   : > { %v6567_v4 = vpop.permute.xlu1 %6566 }
 0x599   : > { %vm6605_vm9 = vcmp.gt.f32.partialorder %v6596_v52, 0.0  ;;  %v6614_v62 = vmul.f32 %v9147_v47, %v6596_v52  ;;  %v6581_v32 = vsel %vm5403_vm3, %v6565_v37, %v6567_v4  ;;  %v6569_v34 = vpop.permute.xlu0 %6568 }
 0x59a   : > { %v6597_v16 = vadd.f32 %v6581_v32, %v6187_v56  ;;  %v6582_v28 = vsel %vm5403_vm3, %v6567_v4, %v6569_v34 }
 0x59b   : > { %v6622_v3 = vsel %vm6605_vm9, %v6596_v52, %v6614_v62  ;;  %v6598_v22 = vadd.f32 %v6582_v28, %v6188_v15 }
 0x59c   : > { %6630 = vst [vmem:[%s9156_s23] sm:$0xff] %v6622_v3  ;;  %vm6606_vm10 = vcmp.gt.f32.partialorder %v6597_v16, 0.0  ;;  %v6615_v44 = vmul.f32 %v9147_v47, %v6597_v16  ;;  %v6571_v17 = vpop.permute.xlu1 %6570 }
 0x59d   : > { %vm6607_vm11 = vcmp.gt.f32.partialorder %v6598_v22, 0.0  ;;  %v6616_v21 = vmul.f32 %v9147_v47, %v6598_v22  ;;  %v6583_v40 = vsel %vm5403_vm3, %v6569_v34, %v6571_v17  ;;  %v6573_v57 = vpop.permute.xlu0 %6572 }
 0x59e   : > { %v6623_v25 = vsel %vm6606_vm10, %v6597_v16, %v6615_v44  ;;  %v6599_v38 = vadd.f32 %v6583_v40, %v6189_v7  ;;  %v6584_v54 = vsel %vm5403_vm3, %v6571_v17, %v6573_v57 }
 0x59f   : > { %6631 = vst [vmem:[%s9156_s23 + $0x8] sm:$0xff] %v6623_v25  ;;  %v6624_v30 = vsel %vm6607_vm11, %v6598_v22, %v6616_v21  ;;  %v6600_v41 = vadd.f32 %v6584_v54, %v6190_v0 }
 0x5a0   : > { %6632 = vst [vmem:[%s9156_s23 + $0x10] sm:$0xff] %v6624_v30  ;;  %vm6608_vm12 = vcmp.gt.f32.partialorder %v6599_v38, 0.0  ;;  %v6617_v45 = vmul.f32 %v9147_v47, %v6599_v38  ;;  %v6575_v55 = vpop.permute.xlu1 %6574 }
 0x5a1   : > { %vm6609_vm13 = vcmp.gt.f32.partialorder %v6600_v41, 0.0  ;;  %v6618_v9 = vmul.f32 %v9147_v47, %v6600_v41  ;;  %v6585_v19 = vsel %vm5403_vm3, %v6573_v57, %v6575_v55  ;;  %v6577_v43 = vpop.permute.xlu0 %6576 }
 0x5a2   : > { %v6625_v59 = vsel %vm6608_vm12, %v6599_v38, %v6617_v45  ;;  %v6601_v26 = vadd.f32 %v6585_v19, %v6191_v14  ;;  %v6586_v5 = vsel %vm5403_vm3, %v6575_v55, %v6577_v43 }
 0x5a3   : > { %6633 = vst [vmem:[%s9156_s23 + $0x18] sm:$0xff] %v6625_v59  ;;  %v6626_v31 = vsel %vm6609_vm13, %v6600_v41, %v6618_v9  ;;  %v6602_v50 = vadd.f32 %v6586_v5, %v6192_v61 }
 0x5a4   : > { %6634 = vst [vmem:[%s9156_s23 + $0x20] sm:$0xff] %v6626_v31  ;;  %vm6610_vm14 = vcmp.gt.f32.partialorder %v6601_v26, 0.0  ;;  %v6619_v8 = vmul.f32 %v9147_v47, %v6601_v26  ;;  %v6579_v23 = vpop.permute.xlu1 %6578 }
 0x5a5   : > { %vm6611_vm15 = vcmp.gt.f32.partialorder %v6602_v50, 0.0  ;;  %v6620_v42 = vmul.f32 %v9147_v47, %v6602_v50  ;;  %v6587_v27 = vsel %vm5403_vm3, %v6577_v43, %v6579_v23 }
 0x5a6   : > { %v6627_v18 = vsel %vm6610_vm14, %v6601_v26, %v6619_v8  ;;  %v6603_v2 = vadd.f32 %v6587_v27, %v6193_v20 }
 0x5a7   : > { %6635 = vst [vmem:[%s9156_s23 + $0x28] sm:$0xff] %v6627_v18  ;;  %v6628_v33 = vsel %vm6611_vm15, %v6602_v50, %v6620_v42 }
 0x5a8   : > { %6636 = vst [vmem:[%s9156_s23 + $0x30] sm:$0xff] %v6628_v33  ;;  %vm6612_vm0 = vcmp.gt.f32.partialorder %v6603_v2, 0.0  ;;  %v6621_v6 = vmul.f32 %v9147_v47, %v6603_v2 }
 0x5aa   : > { %v6629_v36 = vsel %vm6612_vm0, %v6603_v2, %v6621_v6 }
 0x5ab   : > { %6637 = vst [vmem:[%s9156_s23 + $0x38] sm:$0xff] %v6629_v36 }
 0x5ac PF: > { %s17_s25 = sadd.s32 1, %s7306_s25   ;;  %s9333_s23 = smov %s7302_s24 }
 0x5ad   : > { %p14_p5 = scmp.ge.s32.totalorder %s17_s25, 4   ;;  %s9334_s24 = smov %s9336_s5 }
 0x5af   :  { %16 = sbr.rel (!%p14_p5) target bundleno = 2 (0x2), region = 79 }

</bundles_post_ra>
